<compile_context>
chip_gen: v7x
topology: tpu7x:2x2x1
jax: 0.10.0
libtpu: 0.0.40
codegen_flags: <defaults>
</compile_context>

<pallas_src>
import numpy as np
import jax
import jax.numpy as jnp
from jax.experimental import pallas as pl
from jax.experimental.pallas import tpu as pltpu

BN_EPS = 1e-5
_TAPS = tuple((dh, dw) for dh in (-1, 0, 1) for dw in (-1, 0, 1))


# --------------------------------------------------------------------------
# In-kernel helpers (pure jnp / pltpu, traced inside the Pallas kernel body)
# --------------------------------------------------------------------------

def _stack_taps_roll(y, img_w, mask_ref, stack_ref, cin):
    """Pack the 9 shifted+masked tap slabs of a 3x3 conv into stack_ref.

    y: (cin, M) f32 with M = B*H*W (lane axis, multiple of 128).  The tap
    (dh, dw) source of output column j is column j + dh*W + dw, so each tap is
    a circular lane roll (XLU) followed by a precomputed 0/1 boundary mask
    that zeroes padding / row-wraparound columns.
    """
    M = y.shape[1]
    for k, (dh, dw) in enumerate(_TAPS):
        delta = dh * img_w + dw
        rolled = y if delta == 0 else pltpu.roll(y, shift=(-delta) % M, axis=1)
        stack_ref[pl.ds(k * cin, cin), :] = rolled * mask_ref[pl.ds(k, 1), :]


def _stack_taps_select(y_bf16, sel_ref, stack_ref, cin):
    """Tap gather for a layer whose lane width is below one vreg (128): each
    tap slab is a tiny host-precomputed 0/1 selection matmul (exact gather of
    bf16 values; padding taps select the all-zero column)."""
    for k in range(9):
        stack_ref[pl.ds(k * cin, cin), :] = jnp.dot(
            y_bf16, sel_ref[k], preferred_element_type=jnp.float32)


def _conv_bn_relu(stack_ref, w_ref, g_ref, b_ref):
    """One fused (Cout, 9*Cin) x (9*Cin, M) MXU matmul + training-mode BN + ReLU."""
    acc = jnp.dot(w_ref[...], stack_ref[...].astype(jnp.bfloat16),
                  preferred_element_type=jnp.float32)
    mean = jnp.mean(acc, axis=1, keepdims=True)
    cen = acc - mean
    var = jnp.mean(cen * cen, axis=1, keepdims=True)   # two-pass (centered)
    scale = g_ref[...] * jax.lax.rsqrt(var + BN_EPS)
    return jnp.maximum(cen * scale + b_ref[...], 0.0)  # ReLU


def _maxpool2x2(y, img_w, pool_ref):
    """2x2 / stride-2 max pool on a (C, M) slab: two XLU rolls + max, then a
    host-precomputed bf16 0/1 compaction matmul selecting top-left corners."""
    M = y.shape[1]
    m = jnp.maximum(y, pltpu.roll(y, shift=M - 1, axis=1))       # max(w, w+1)
    m = jnp.maximum(m, pltpu.roll(m, shift=M - img_w, axis=1))   # max(h, h+1)
    return jnp.dot(m.astype(jnp.bfloat16), pool_ref[...],
                   preferred_element_type=jnp.float32)


# --------------------------------------------------------------------------
# Fused encoder kernel (closure over static image widths / channel padding)
# --------------------------------------------------------------------------

def _make_encoder_kernel(img_w0, img_w1, cin0p):
    def kernel(x_ref,
               m0_ref, cw0_ref, g0_ref, b0_ref,
               p1_ref, m1_ref, cw1_ref, g1_ref, b1_ref,
               p2_ref, s2_ref, cw2_ref, g2_ref, b2_ref,
               wf_ref, bf_ref,
               enc1_ref, enc2_ref, fc_ref,
               st0_ref, st1_ref, st2_ref):
        # conv_in: SingleConv(in_channels, 16) at full resolution
        _stack_taps_roll(x_ref[...], img_w0, m0_ref, st0_ref, cin0p)
        y0 = _conv_bn_relu(st0_ref, cw0_ref, g0_ref, b0_ref)
        enc1_ref[...] = y0                                # (16, B*H*W)
        # down1: MaxPool2d(2) -> SingleConv(16, 32)
        pooled1 = _maxpool2x2(y0, img_w0, p1_ref)
        _stack_taps_roll(pooled1, img_w1, m1_ref, st1_ref, 16)
        y1 = _conv_bn_relu(st1_ref, cw1_ref, g1_ref, b1_ref)
        enc2_ref[...] = y1                                # (32, B*H/2*W/2)
        # down2: MaxPool2d(2) -> SingleConv(32, 32).  Lane width here is < 128,
        # so taps come from precomputed selection matmuls, not rolls.
        pooled2 = _maxpool2x2(y1, img_w1, p2_ref)
        _stack_taps_select(pooled2.astype(jnp.bfloat16), s2_ref, st2_ref, 32)
        y2 = _conv_bn_relu(st2_ref, cw2_ref, g2_ref, b2_ref)
        # fc = OutConv(32, 2): 1x1 conv == channel matmul (f32, tiny)
        fc_ref[...] = jnp.dot(wf_ref[...], y2,
                              preferred_element_type=jnp.float32) + bf_ref[...]
    return kernel


# --------------------------------------------------------------------------
# Static tables (numpy, built at trace time)
# --------------------------------------------------------------------------

def _tap_masks(B, Hh, Ww):
    """(9, B*Hh*Ww) f32: 1 where the tap source is inside the image, else 0."""
    b, h, w = np.meshgrid(np.arange(B), np.arange(Hh), np.arange(Ww),
                          indexing="ij")
    masks = []
    for dh, dw in _TAPS:
        valid = (h + dh >= 0) & (h + dh < Hh) & (w + dw >= 0) & (w + dw < Ww)
        masks.append(valid.reshape(-1).astype(np.float32))
    return np.stack(masks)


def _pool_select_matrix(B, Hh, Ww):
    """(B*Hh*Ww, B*(Hh//2)*(Ww//2)) 0/1 compaction matrix picking the top-left
    corner column of every 2x2 window (the rolled max lives there)."""
    Ho, Wo = Hh // 2, Ww // 2
    P = np.zeros((B * Hh * Ww, B * Ho * Wo), np.float32)
    b, i, j = np.meshgrid(np.arange(B), np.arange(Ho), np.arange(Wo),
                          indexing="ij")
    src = ((b * Hh + 2 * i) * Ww + 2 * j).reshape(-1)
    P[src, np.arange(B * Ho * Wo)] = 1.0
    return P


def _tap_select_matrices(B, Hh, Ww):
    """(9, M, M) 0/1: S[k, src, j] = 1 iff tap k of output column j reads
    source column src (padding taps select nothing -> all-zero column)."""
    M = B * Hh * Ww
    S = np.zeros((9, M, M), np.float32)
    b, h, w = np.meshgrid(np.arange(B), np.arange(Hh), np.arange(Ww),
                          indexing="ij")
    cols = np.arange(M)
    for k, (dh, dw) in enumerate(_TAPS):
        hs, ws = h + dh, w + dw
        valid = ((hs >= 0) & (hs < Hh) & (ws >= 0) & (ws < Ww)).reshape(-1)
        src = ((b * Hh + hs) * Ww + ws).reshape(-1)
        S[k, src[valid], cols[valid]] = 1.0
    return S


# --------------------------------------------------------------------------
# Parameters, weight prep, forward wrapper
# --------------------------------------------------------------------------

def init_encoder_params(key, in_channels):
    """Parameters in PyTorch layouts (Conv2d OIHW, BN weight/bias vectors)."""
    def conv_block(k, cin, cout):
        w = jax.random.normal(k, (cout, cin, 3, 3), jnp.float32) * 0.1
        gamma = jnp.ones((cout,), jnp.float32)   # BatchNorm2d.weight default
        beta = jnp.zeros((cout,), jnp.float32)   # BatchNorm2d.bias default
        return (w, gamma, beta)                  # conv bias cancelled by BN

    ks = jax.random.split(key, 5)
    return {
        "conv_in": conv_block(ks[0], in_channels, 16),
        "down1": conv_block(ks[1], 16, 32),
        "down2": conv_block(ks[2], 32, 32),
        "fc_w": jax.random.normal(ks[3], (2, 32, 1, 1), jnp.float32) * 0.1,
        "fc_b": jax.random.normal(ks[4], (2,), jnp.float32) * 0.1,
    }


def _prep_conv_fused(w_oihw, cin_pad=None):
    """(Cout,Cin,3,3) torch layout -> (Cout, 9*cin_pad) bf16, tap-major K axis."""
    cout, cin = w_oihw.shape[:2]
    w = jnp.transpose(w_oihw, (0, 2, 3, 1)).reshape(cout, 9, cin)
    if cin_pad is not None and cin_pad > cin:
        w = jnp.pad(w, ((0, 0), (0, 0), (0, cin_pad - cin)))
    return w.reshape(cout, -1).astype(jnp.bfloat16)


def _fs(shape):
    """Full-array BlockSpec (block == whole array, single grid step)."""
    return pl.BlockSpec(shape, lambda i, _n=len(shape): (0,) * _n)


def encoder_forward(params, x_nchw):
    """Mirrors Encoder.forward (conv_down=False path, training-mode BN)."""
    B, Cin, H, W = x_nchw.shape
    assert H % 4 == 0 and W % 4 == 0, "spatial dims must be divisible by 4"
    H1, W1, H2, W2 = H // 2, W // 2, H // 4, W // 4
    M0, M1, M2 = B * H * W, B * H1 * W1, B * H2 * W2
    # roll-based tap gather needs full-vreg lane widths at layers 0 / 1
    assert M0 % 128 == 0 and M1 % 128 == 0

    cin0p = -(-Cin // 8) * 8             # pad in-channels to a sublane multiple

    # transposed lane-dense activation layout: (channels, batch*spatial)
    xT = jnp.transpose(x_nchw, (1, 0, 2, 3)).reshape(Cin, M0)
    if cin0p > Cin:
        xT = jnp.pad(xT, ((0, cin0p - Cin), (0, 0)))

    # static gather tables
    mask0 = jnp.asarray(_tap_masks(B, H, W))
    mask1 = jnp.asarray(_tap_masks(B, H1, W1))
    pool1 = jnp.asarray(_pool_select_matrix(B, H, W), dtype=jnp.bfloat16)
    pool2 = jnp.asarray(_pool_select_matrix(B, H1, W1), dtype=jnp.bfloat16)
    sel2 = jnp.asarray(_tap_select_matrices(B, H2, W2), dtype=jnp.bfloat16)

    (w0, g0, b0) = params["conv_in"]
    (w1, g1, b1) = params["down1"]
    (w2, g2, b2) = params["down2"]
    args = (
        xT,
        mask0, _prep_conv_fused(w0, cin0p), g0.reshape(-1, 1), b0.reshape(-1, 1),
        pool1, mask1, _prep_conv_fused(w1), g1.reshape(-1, 1), b1.reshape(-1, 1),
        pool2, sel2, _prep_conv_fused(w2), g2.reshape(-1, 1), b2.reshape(-1, 1),
        params["fc_w"].reshape(2, 32), params["fc_b"].reshape(2, 1),
    )

    # advisory cost estimate (fused conv matmuls, pool compaction, tap selects, fc)
    flops = (2 * 9 * cin0p * 16 * M0 + 2 * 9 * 16 * 32 * M1 + 2 * 9 * 32 * 32 * M2
             + 2 * 16 * M0 * M1 + 2 * 32 * M1 * M2
             + 9 * 2 * 32 * M2 * M2
             + 2 * 2 * 32 * M2)
    out_bytes = (16 * M0 + 32 * M1 + 2 * M2) * 4
    in_bytes = sum(int(a.size) * a.dtype.itemsize for a in args)

    kernel = _make_encoder_kernel(W, W1, cin0p)

    enc1T, enc2T, fcT = pl.pallas_call(
        kernel,
        out_shape=(
            jax.ShapeDtypeStruct((16, M0), jnp.float32),
            jax.ShapeDtypeStruct((32, M1), jnp.float32),
            jax.ShapeDtypeStruct((2, M2), jnp.float32),
        ),
        # Whole problem (<1 MiB live) fits in VMEM on every generation incl.
        # v7x's 64 MiB, so a single grid step.  NOTE: a batch-parallel grid
        # (to use v7x's 2nd TensorCore) would also shard the BatchNorm batch
        # statistics and needs a two-phase stats exchange; not worth it at
        # this problem size.
        grid=(1,),
        in_specs=[_fs(a.shape) for a in args],
        out_specs=(_fs((16, M0)), _fs((32, M1)), _fs((2, M2))),
        scratch_shapes=[
            pltpu.VMEM((9 * cin0p, M0), jnp.float32),   # layer-0 tap stack
            pltpu.VMEM((9 * 16, M1), jnp.float32),      # layer-1 tap stack
            pltpu.VMEM((9 * 32, M2), jnp.float32),      # layer-2 tap stack
        ],
        compiler_params=pltpu.CompilerParams(
            dimension_semantics=("arbitrary",)),
        cost_estimate=pl.CostEstimate(flops=flops, transcendentals=80,
                                      bytes_accessed=in_bytes + out_bytes),
    )(*args)

    # back to PyTorch NCHW conventions (tiny XLA glue on module outputs only)
    enc1 = enc1T.reshape(16, B, H, W).transpose(1, 0, 2, 3)
    enc2 = enc2T.reshape(32, B, H1, W1).transpose(1, 0, 2, 3)
    # x.view(batch, -1).chunk(2, dim=1) on NCHW -> per-channel flatten
    mu = fcT[0].reshape(B, H2 * W2)
    logvar = jnp.clip(fcT[1].reshape(B, H2 * W2), -20.0, 2.0)

    enc = [x_nchw, enc1, enc2]
    # TODO(synk): torch.distributions.MultivariateNormal(mu, diag(exp(logvar)))
    # has no Pallas equivalent; return its parameters (mu, logvar) instead.
    return (mu, logvar), enc


# --------------------------------------------------------------------------
# Pure-JAX reference (same assumed architecture) for numerical validation
# --------------------------------------------------------------------------

def encoder_reference(params, x):
    def conv_bn_relu(h, block):
        w, g, b = block
        y = jax.lax.conv_general_dilated(
            h.astype(jnp.bfloat16), w.astype(jnp.bfloat16),
            window_strides=(1, 1), padding=((1, 1), (1, 1)),
            dimension_numbers=("NCHW", "OIHW", "NCHW"),
            preferred_element_type=jnp.float32)
        mean = jnp.mean(y, axis=(0, 2, 3), keepdims=True)
        var = jnp.mean(jnp.square(y - mean), axis=(0, 2, 3), keepdims=True)
        yn = (y - mean) * jax.lax.rsqrt(var + BN_EPS)
        yn = yn * g.reshape(1, -1, 1, 1) + b.reshape(1, -1, 1, 1)
        return jnp.maximum(yn, 0.0)

    def pool(h):
        return jax.lax.reduce_window(h, -jnp.inf, jax.lax.max,
                                     (1, 1, 2, 2), (1, 1, 2, 2), "VALID")

    B = x.shape[0]
    y0 = conv_bn_relu(x, params["conv_in"])
    y1 = conv_bn_relu(pool(y0), params["down1"])
    y2 = conv_bn_relu(pool(y1), params["down2"])
    fc = jnp.einsum("oc,bchw->bohw", params["fc_w"].reshape(2, 32), y2)
    fc = fc + params["fc_b"].reshape(1, 2, 1, 1)
    flat = fc.reshape(B, -1)
    mu, logvar = jnp.split(flat, 2, axis=1)
    return mu, jnp.clip(logvar, -20.0, 2.0), y0, y1


if __name__ == "__main__":
    key = jax.random.PRNGKey(0)
    kx, kp = jax.random.split(key)

    B, Cin, H, W = 2, 4, 16, 16                 # dim_z = (H/4)*(W/4) = 16
    x = jax.random.normal(kx, (B, Cin, H, W), jnp.float32)
    params = init_encoder_params(kp, in_channels=Cin)

    (mu, logvar), enc = jax.jit(encoder_forward)(params, x)
    jax.block_until_ready((mu, logvar, enc))

    # shape checks
    assert mu.shape == (B, 16) and logvar.shape == (B, 16)
    assert enc[0].shape == (B, Cin, H, W)
    assert enc[1].shape == (B, 16, H, W)
    assert enc[2].shape == (B, 32, H // 2, W // 2)
    assert bool(jnp.all(jnp.isfinite(mu))) and bool(jnp.all(jnp.isfinite(logvar)))
    assert bool(jnp.all(logvar <= 2.0)) and bool(jnp.all(logvar >= -20.0))

    # numerical check against the pure-JAX reference
    mu_r, lv_r, y0_r, y1_r = jax.jit(encoder_reference)(params, x)
    np.testing.assert_allclose(np.asarray(enc[1]), np.asarray(y0_r),
                               atol=5e-3, rtol=5e-3)
    np.testing.assert_allclose(np.asarray(enc[2]), np.asarray(y1_r),
                               atol=5e-3, rtol=5e-3)
    np.testing.assert_allclose(np.asarray(mu), np.asarray(mu_r),
                               atol=5e-3, rtol=5e-3)
    np.testing.assert_allclose(np.asarray(logvar), np.asarray(lv_r),
                               atol=5e-3, rtol=5e-3)
    print("KERNEL_OK")
</pallas_src>

<mosaic_0001>
module attributes {stable_mosaic.version = 11 : i64} {
  func.func @kernel(%arg0: i32, %arg1: memref<8x512xf32, #tpu.memory_space<vmem>>, %arg2: memref<9x512xf32, #tpu.memory_space<vmem>>, %arg3: memref<16x72xbf16, #tpu.memory_space<vmem>>, %arg4: memref<16x1xf32, #tpu.memory_space<vmem>>, %arg5: memref<16x1xf32, #tpu.memory_space<vmem>>, %arg6: memref<512x128xbf16, #tpu.memory_space<vmem>>, %arg7: memref<9x128xf32, #tpu.memory_space<vmem>>, %arg8: memref<32x144xbf16, #tpu.memory_space<vmem>>, %arg9: memref<32x1xf32, #tpu.memory_space<vmem>>, %arg10: memref<32x1xf32, #tpu.memory_space<vmem>>, %arg11: memref<128x32xbf16, #tpu.memory_space<vmem>>, %arg12: memref<9x32x32xbf16, #tpu.memory_space<vmem>>, %arg13: memref<32x288xbf16, #tpu.memory_space<vmem>>, %arg14: memref<32x1xf32, #tpu.memory_space<vmem>>, %arg15: memref<32x1xf32, #tpu.memory_space<vmem>>, %arg16: memref<2x32xf32, #tpu.memory_space<vmem>>, %arg17: memref<2x1xf32, #tpu.memory_space<vmem>>, %arg18: memref<16x512xf32, #tpu.memory_space<vmem>>, %arg19: memref<32x128xf32, #tpu.memory_space<vmem>>, %arg20: memref<2x32xf32, #tpu.memory_space<vmem>>, %arg21: memref<72x512xf32, #tpu.memory_space<vmem>>, %arg22: memref<144x128xf32, #tpu.memory_space<vmem>>, %arg23: memref<288x32xf32, #tpu.memory_space<vmem>>) attributes {dimension_semantics = [#tpu.dimension_semantics<arbitrary>], iteration_bounds = array<i64: 1>, scalar_prefetch = 0 : i64, scratch_operands = 3 : i64, tpu.core_type = #tpu.core_type<tc>, window_params = [{pipeline_mode = #tpu.pipeline_mode<synchronous>, transform_indices = @transform_0, window_bounds = array<i64: 8, 512>}, {pipeline_mode = #tpu.pipeline_mode<synchronous>, transform_indices = @transform_1, window_bounds = array<i64: 9, 512>}, {pipeline_mode = #tpu.pipeline_mode<synchronous>, transform_indices = @transform_2, window_bounds = array<i64: 16, 72>}, {pipeline_mode = #tpu.pipeline_mode<synchronous>, transform_indices = @transform_3, window_bounds = array<i64: 16, 1>}, {pipeline_mode = #tpu.pipeline_mode<synchronous>, transform_indices = @transform_4, window_bounds = array<i64: 16, 1>}, {pipeline_mode = #tpu.pipeline_mode<synchronous>, transform_indices = @transform_5, window_bounds = array<i64: 512, 128>}, {pipeline_mode = #tpu.pipeline_mode<synchronous>, transform_indices = @transform_6, window_bounds = array<i64: 9, 128>}, {pipeline_mode = #tpu.pipeline_mode<synchronous>, transform_indices = @transform_7, window_bounds = array<i64: 32, 144>}, {pipeline_mode = #tpu.pipeline_mode<synchronous>, transform_indices = @transform_8, window_bounds = array<i64: 32, 1>}, {pipeline_mode = #tpu.pipeline_mode<synchronous>, transform_indices = @transform_9, window_bounds = array<i64: 32, 1>}, {pipeline_mode = #tpu.pipeline_mode<synchronous>, transform_indices = @transform_10, window_bounds = array<i64: 128, 32>}, {pipeline_mode = #tpu.pipeline_mode<synchronous>, transform_indices = @transform_11, window_bounds = array<i64: 9, 32, 32>}, {pipeline_mode = #tpu.pipeline_mode<synchronous>, transform_indices = @transform_12, window_bounds = array<i64: 32, 288>}, {pipeline_mode = #tpu.pipeline_mode<synchronous>, transform_indices = @transform_13, window_bounds = array<i64: 32, 1>}, {pipeline_mode = #tpu.pipeline_mode<synchronous>, transform_indices = @transform_14, window_bounds = array<i64: 32, 1>}, {pipeline_mode = #tpu.pipeline_mode<synchronous>, transform_indices = @transform_15, window_bounds = array<i64: 2, 32>}, {pipeline_mode = #tpu.pipeline_mode<synchronous>, transform_indices = @transform_16, window_bounds = array<i64: 2, 1>}, {pipeline_mode = #tpu.pipeline_mode<synchronous>, transform_indices = @transform_17, window_bounds = array<i64: 16, 512>}, {pipeline_mode = #tpu.pipeline_mode<synchronous>, transform_indices = @transform_18, window_bounds = array<i64: 32, 128>}, {pipeline_mode = #tpu.pipeline_mode<synchronous>, transform_indices = @transform_19, window_bounds = array<i64: 2, 32>}]} {
    %c0 = arith.constant 0 : index
    %c0_0 = arith.constant 0 : index
    %0 = vector.load %arg1[%c0, %c0_0] : memref<8x512xf32, #tpu.memory_space<vmem>>, vector<8x512xf32>
    %c17_i32 = arith.constant 17 : i32
    %1 = tpu.dynamic_rotate %0 by %c17_i32 dim 1 : vector<8x512xf32>, i32 -> vector<8x512xf32>
    %c0_1 = arith.constant 0 : index
    %c0_2 = arith.constant 0 : index
    %2 = vector.load %arg2[%c0_1, %c0_2] : memref<9x512xf32, #tpu.memory_space<vmem>>, vector<1x512xf32>
    %3 = vector.broadcast %2 : vector<1x512xf32> to vector<8x512xf32>
    %4 = arith.mulf %1, %3 : vector<8x512xf32>
    %c0_3 = arith.constant 0 : index
    %c0_4 = arith.constant 0 : index
    %5 = vector.load %arg21[%c0_3, %c0_4] : memref<72x512xf32, #tpu.memory_space<vmem>>, vector<8x512xf32>
    tpu.vector_store %arg21[%c0_3, %c0_4], %4 {strides = array<i32>} : memref<72x512xf32, #tpu.memory_space<vmem>>, vector<8x512xf32>,
    %c16_i32 = arith.constant 16 : i32
    %6 = tpu.dynamic_rotate %0 by %c16_i32 dim 1 : vector<8x512xf32>, i32 -> vector<8x512xf32>
    %c1 = arith.constant 1 : index
    %c0_5 = arith.constant 0 : index
    %7 = vector.load %arg2[%c1, %c0_5] : memref<9x512xf32, #tpu.memory_space<vmem>>, vector<1x512xf32>
    %8 = vector.broadcast %7 : vector<1x512xf32> to vector<8x512xf32>
    %9 = arith.mulf %6, %8 : vector<8x512xf32>
    %c8 = arith.constant 8 : index
    %c0_6 = arith.constant 0 : index
    %10 = vector.load %arg21[%c8, %c0_6] : memref<72x512xf32, #tpu.memory_space<vmem>>, vector<8x512xf32>
    tpu.vector_store %arg21[%c8, %c0_6], %9 {strides = array<i32>} : memref<72x512xf32, #tpu.memory_space<vmem>>, vector<8x512xf32>,
    %c15_i32 = arith.constant 15 : i32
    %11 = tpu.dynamic_rotate %0 by %c15_i32 dim 1 : vector<8x512xf32>, i32 -> vector<8x512xf32>
    %c2 = arith.constant 2 : index
    %c0_7 = arith.constant 0 : index
    %12 = vector.load %arg2[%c2, %c0_7] : memref<9x512xf32, #tpu.memory_space<vmem>>, vector<1x512xf32>
    %13 = vector.broadcast %12 : vector<1x512xf32> to vector<8x512xf32>
    %14 = arith.mulf %11, %13 : vector<8x512xf32>
    %c16 = arith.constant 16 : index
    %c0_8 = arith.constant 0 : index
    %15 = vector.load %arg21[%c16, %c0_8] : memref<72x512xf32, #tpu.memory_space<vmem>>, vector<8x512xf32>
    tpu.vector_store %arg21[%c16, %c0_8], %14 {strides = array<i32>} : memref<72x512xf32, #tpu.memory_space<vmem>>, vector<8x512xf32>,
    %c1_i32 = arith.constant 1 : i32
    %16 = tpu.dynamic_rotate %0 by %c1_i32 dim 1 : vector<8x512xf32>, i32 -> vector<8x512xf32>
    %c3 = arith.constant 3 : index
    %c0_9 = arith.constant 0 : index
    %17 = vector.load %arg2[%c3, %c0_9] : memref<9x512xf32, #tpu.memory_space<vmem>>, vector<1x512xf32>
    %18 = vector.broadcast %17 : vector<1x512xf32> to vector<8x512xf32>
    %19 = arith.mulf %16, %18 : vector<8x512xf32>
    %c24 = arith.constant 24 : index
    %c0_10 = arith.constant 0 : index
    %20 = vector.load %arg21[%c24, %c0_10] : memref<72x512xf32, #tpu.memory_space<vmem>>, vector<8x512xf32>
    tpu.vector_store %arg21[%c24, %c0_10], %19 {strides = array<i32>} : memref<72x512xf32, #tpu.memory_space<vmem>>, vector<8x512xf32>,
    %c4 = arith.constant 4 : index
    %c0_11 = arith.constant 0 : index
    %21 = vector.load %arg2[%c4, %c0_11] : memref<9x512xf32, #tpu.memory_space<vmem>>, vector<1x512xf32>
    %22 = vector.broadcast %21 : vector<1x512xf32> to vector<8x512xf32>
    %23 = arith.mulf %0, %22 : vector<8x512xf32>
    %c32 = arith.constant 32 : index
    %c0_12 = arith.constant 0 : index
    %24 = vector.load %arg21[%c32, %c0_12] : memref<72x512xf32, #tpu.memory_space<vmem>>, vector<8x512xf32>
    tpu.vector_store %arg21[%c32, %c0_12], %23 {strides = array<i32>} : memref<72x512xf32, #tpu.memory_space<vmem>>, vector<8x512xf32>,
    %c511_i32 = arith.constant 511 : i32
    %25 = tpu.dynamic_rotate %0 by %c511_i32 dim 1 : vector<8x512xf32>, i32 -> vector<8x512xf32>
    %c5 = arith.constant 5 : index
    %c0_13 = arith.constant 0 : index
    %26 = vector.load %arg2[%c5, %c0_13] : memref<9x512xf32, #tpu.memory_space<vmem>>, vector<1x512xf32>
    %27 = vector.broadcast %26 : vector<1x512xf32> to vector<8x512xf32>
    %28 = arith.mulf %25, %27 : vector<8x512xf32>
    %c40 = arith.constant 40 : index
    %c0_14 = arith.constant 0 : index
    %29 = vector.load %arg21[%c40, %c0_14] : memref<72x512xf32, #tpu.memory_space<vmem>>, vector<8x512xf32>
    tpu.vector_store %arg21[%c40, %c0_14], %28 {strides = array<i32>} : memref<72x512xf32, #tpu.memory_space<vmem>>, vector<8x512xf32>,
    %c497_i32 = arith.constant 497 : i32
    %30 = tpu.dynamic_rotate %0 by %c497_i32 dim 1 : vector<8x512xf32>, i32 -> vector<8x512xf32>
    %c6 = arith.constant 6 : index
    %c0_15 = arith.constant 0 : index
    %31 = vector.load %arg2[%c6, %c0_15] : memref<9x512xf32, #tpu.memory_space<vmem>>, vector<1x512xf32>
    %32 = vector.broadcast %31 : vector<1x512xf32> to vector<8x512xf32>
    %33 = arith.mulf %30, %32 : vector<8x512xf32>
    %c48 = arith.constant 48 : index
    %c0_16 = arith.constant 0 : index
    %34 = vector.load %arg21[%c48, %c0_16] : memref<72x512xf32, #tpu.memory_space<vmem>>, vector<8x512xf32>
    tpu.vector_store %arg21[%c48, %c0_16], %33 {strides = array<i32>} : memref<72x512xf32, #tpu.memory_space<vmem>>, vector<8x512xf32>,
    %c496_i32 = arith.constant 496 : i32
    %35 = tpu.dynamic_rotate %0 by %c496_i32 dim 1 : vector<8x512xf32>, i32 -> vector<8x512xf32>
    %c7 = arith.constant 7 : index
    %c0_17 = arith.constant 0 : index
    %36 = vector.load %arg2[%c7, %c0_17] : memref<9x512xf32, #tpu.memory_space<vmem>>, vector<1x512xf32>
    %37 = vector.broadcast %36 : vector<1x512xf32> to vector<8x512xf32>
    %38 = arith.mulf %35, %37 : vector<8x512xf32>
    %c56 = arith.constant 56 : index
    %c0_18 = arith.constant 0 : index
    %39 = vector.load %arg21[%c56, %c0_18] : memref<72x512xf32, #tpu.memory_space<vmem>>, vector<8x512xf32>
    tpu.vector_store %arg21[%c56, %c0_18], %38 {strides = array<i32>} : memref<72x512xf32, #tpu.memory_space<vmem>>, vector<8x512xf32>,
    %c495_i32 = arith.constant 495 : i32
    %40 = tpu.dynamic_rotate %0 by %c495_i32 dim 1 : vector<8x512xf32>, i32 -> vector<8x512xf32>
    %c8_19 = arith.constant 8 : index
    %c0_20 = arith.constant 0 : index
    %41 = vector.load %arg2[%c8_19, %c0_20] : memref<9x512xf32, #tpu.memory_space<vmem>>, vector<1x512xf32>
    %42 = vector.broadcast %41 : vector<1x512xf32> to vector<8x512xf32>
    %43 = arith.mulf %40, %42 : vector<8x512xf32>
    %c64 = arith.constant 64 : index
    %c0_21 = arith.constant 0 : index
    %44 = vector.load %arg21[%c64, %c0_21] : memref<72x512xf32, #tpu.memory_space<vmem>>, vector<8x512xf32>
    tpu.vector_store %arg21[%c64, %c0_21], %43 {strides = array<i32>} : memref<72x512xf32, #tpu.memory_space<vmem>>, vector<8x512xf32>,
    %c0_22 = arith.constant 0 : index
    %c0_23 = arith.constant 0 : index
    %45 = vector.load %arg3[%c0_22, %c0_23] : memref<16x72xbf16, #tpu.memory_space<vmem>>, vector<16x72xbf16>
    %c0_24 = arith.constant 0 : index
    %c0_25 = arith.constant 0 : index
    %46 = vector.load %arg21[%c0_24, %c0_25] : memref<72x512xf32, #tpu.memory_space<vmem>>, vector<72x512xf32>
    %47 = arith.truncf %46 : vector<72x512xf32> to vector<72x512xbf16>
    %cst = arith.constant dense<0.000000e+00> : vector<16x512xf32>
    %48 = tpu.matmul %45, %47, %cst {dimension_numbers = #tpu.dot_dimension_numbers<[1], [0], [0], [1], [0, 0, 1, 1], [], []>} : vector<16x72xbf16>, vector<72x512xbf16>, vector<16x512xf32> -> vector<16x512xf32>
    %cst_26 = arith.constant dense<0.000000e+00> : vector<16xf32>
    %49 = vector.multi_reduction <add>, %48, %cst_26 [1] : vector<16x512xf32> to vector<16xf32>
    %50 = vector.shape_cast %49 : vector<16xf32> to vector<16x1xf32>
    %cst_27 = arith.constant 5.120000e+02 : f32
    %51 = vector.broadcast %cst_27 : f32 to vector<16x1xf32>
    %52 = arith.divf %50, %51 : vector<16x1xf32>
    %53 = vector.broadcast %52 : vector<16x1xf32> to vector<16x512xf32>
    %54 = arith.subf %48, %53 : vector<16x512xf32>
    %55 = arith.mulf %54, %54 : vector<16x512xf32>
    %cst_28 = arith.constant dense<0.000000e+00> : vector<16xf32>
    %56 = vector.multi_reduction <add>, %55, %cst_28 [1] : vector<16x512xf32> to vector<16xf32>
    %57 = vector.shape_cast %56 : vector<16xf32> to vector<16x1xf32>
    %cst_29 = arith.constant 5.120000e+02 : f32
    %58 = vector.broadcast %cst_29 : f32 to vector<16x1xf32>
    %59 = arith.divf %57, %58 : vector<16x1xf32>
    %c0_30 = arith.constant 0 : index
    %c0_31 = arith.constant 0 : index
    %60 = vector.load %arg4[%c0_30, %c0_31] : memref<16x1xf32, #tpu.memory_space<vmem>>, vector<16x1xf32>
    %cst_32 = arith.constant 9.99999974E-6 : f32
    %61 = vector.broadcast %cst_32 : f32 to vector<16x1xf32>
    %62 = arith.addf %59, %61 : vector<16x1xf32>
    %63 = math.rsqrt %62 : vector<16x1xf32>
    %64 = arith.mulf %60, %63 : vector<16x1xf32>
    %65 = vector.broadcast %64 : vector<16x1xf32> to vector<16x512xf32>
    %66 = arith.mulf %54, %65 : vector<16x512xf32>
    %c0_33 = arith.constant 0 : index
    %c0_34 = arith.constant 0 : index
    %67 = vector.load %arg5[%c0_33, %c0_34] : memref<16x1xf32, #tpu.memory_space<vmem>>, vector<16x1xf32>
    %68 = vector.broadcast %67 : vector<16x1xf32> to vector<16x512xf32>
    %69 = arith.addf %66, %68 : vector<16x512xf32>
    %cst_35 = arith.constant 0.000000e+00 : f32
    %70 = vector.broadcast %cst_35 : f32 to vector<16x512xf32>
    %71 = arith.maximumf %69, %70 : vector<16x512xf32>
    %c0_36 = arith.constant 0 : index
    %c0_37 = arith.constant 0 : index
    %72 = vector.load %arg18[%c0_36, %c0_37] : memref<16x512xf32, #tpu.memory_space<vmem>>, vector<16x512xf32>
    tpu.vector_store %arg18[%c0_36, %c0_37], %71 {strides = array<i32>} : memref<16x512xf32, #tpu.memory_space<vmem>>, vector<16x512xf32>,
    %c511_i32_38 = arith.constant 511 : i32
    %73 = tpu.dynamic_rotate %71 by %c511_i32_38 dim 1 : vector<16x512xf32>, i32 -> vector<16x512xf32>
    %74 = arith.maximumf %71, %73 : vector<16x512xf32>
    %c496_i32_39 = arith.constant 496 : i32
    %75 = tpu.dynamic_rotate %74 by %c496_i32_39 dim 1 : vector<16x512xf32>, i32 -> vector<16x512xf32>
    %76 = arith.maximumf %74, %75 : vector<16x512xf32>
    %77 = arith.truncf %76 : vector<16x512xf32> to vector<16x512xbf16>
    %c0_40 = arith.constant 0 : index
    %c0_41 = arith.constant 0 : index
    %78 = vector.load %arg6[%c0_40, %c0_41] : memref<512x128xbf16, #tpu.memory_space<vmem>>, vector<512x128xbf16>
    %cst_42 = arith.constant dense<0.000000e+00> : vector<16x128xf32>
    %79 = tpu.matmul %77, %78, %cst_42 {dimension_numbers = #tpu.dot_dimension_numbers<[1], [0], [0], [1], [0, 0, 1, 1], [], []>} : vector<16x512xbf16>, vector<512x128xbf16>, vector<16x128xf32> -> vector<16x128xf32>
    %c9_i32 = arith.constant 9 : i32
    %80 = tpu.dynamic_rotate %79 by %c9_i32 dim 1 : vector<16x128xf32>, i32 -> vector<16x128xf32>
    %c0_43 = arith.constant 0 : index
    %c0_44 = arith.constant 0 : index
    %81 = vector.load %arg7[%c0_43, %c0_44] : memref<9x128xf32, #tpu.memory_space<vmem>>, vector<1x128xf32>
    %82 = vector.broadcast %81 : vector<1x128xf32> to vector<16x128xf32>
    %83 = arith.mulf %80, %82 : vector<16x128xf32>
    %c0_45 = arith.constant 0 : index
    %c0_46 = arith.constant 0 : index
    %84 = vector.load %arg22[%c0_45, %c0_46] : memref<144x128xf32, #tpu.memory_space<vmem>>, vector<16x128xf32>
    tpu.vector_store %arg22[%c0_45, %c0_46], %83 {strides = array<i32>} : memref<144x128xf32, #tpu.memory_space<vmem>>, vector<16x128xf32>,
    %c8_i32 = arith.constant 8 : i32
    %85 = tpu.dynamic_rotate %79 by %c8_i32 dim 1 : vector<16x128xf32>, i32 -> vector<16x128xf32>
    %c1_47 = arith.constant 1 : index
    %c0_48 = arith.constant 0 : index
    %86 = vector.load %arg7[%c1_47, %c0_48] : memref<9x128xf32, #tpu.memory_space<vmem>>, vector<1x128xf32>
    %87 = vector.broadcast %86 : vector<1x128xf32> to vector<16x128xf32>
    %88 = arith.mulf %85, %87 : vector<16x128xf32>
    %c16_49 = arith.constant 16 : index
    %c0_50 = arith.constant 0 : index
    %89 = vector.load %arg22[%c16_49, %c0_50] : memref<144x128xf32, #tpu.memory_space<vmem>>, vector<16x128xf32>
    tpu.vector_store %arg22[%c16_49, %c0_50], %88 {strides = array<i32>} : memref<144x128xf32, #tpu.memory_space<vmem>>, vector<16x128xf32>,
    %c7_i32 = arith.constant 7 : i32
    %90 = tpu.dynamic_rotate %79 by %c7_i32 dim 1 : vector<16x128xf32>, i32 -> vector<16x128xf32>
    %c2_51 = arith.constant 2 : index
    %c0_52 = arith.constant 0 : index
    %91 = vector.load %arg7[%c2_51, %c0_52] : memref<9x128xf32, #tpu.memory_space<vmem>>, vector<1x128xf32>
    %92 = vector.broadcast %91 : vector<1x128xf32> to vector<16x128xf32>
    %93 = arith.mulf %90, %92 : vector<16x128xf32>
    %c32_53 = arith.constant 32 : index
    %c0_54 = arith.constant 0 : index
    %94 = vector.load %arg22[%c32_53, %c0_54] : memref<144x128xf32, #tpu.memory_space<vmem>>, vector<16x128xf32>
    tpu.vector_store %arg22[%c32_53, %c0_54], %93 {strides = array<i32>} : memref<144x128xf32, #tpu.memory_space<vmem>>, vector<16x128xf32>,
    %c1_i32_55 = arith.constant 1 : i32
    %95 = tpu.dynamic_rotate %79 by %c1_i32_55 dim 1 : vector<16x128xf32>, i32 -> vector<16x128xf32>
    %c3_56 = arith.constant 3 : index
    %c0_57 = arith.constant 0 : index
    %96 = vector.load %arg7[%c3_56, %c0_57] : memref<9x128xf32, #tpu.memory_space<vmem>>, vector<1x128xf32>
    %97 = vector.broadcast %96 : vector<1x128xf32> to vector<16x128xf32>
    %98 = arith.mulf %95, %97 : vector<16x128xf32>
    %c48_58 = arith.constant 48 : index
    %c0_59 = arith.constant 0 : index
    %99 = vector.load %arg22[%c48_58, %c0_59] : memref<144x128xf32, #tpu.memory_space<vmem>>, vector<16x128xf32>
    tpu.vector_store %arg22[%c48_58, %c0_59], %98 {strides = array<i32>} : memref<144x128xf32, #tpu.memory_space<vmem>>, vector<16x128xf32>,
    %c4_60 = arith.constant 4 : index
    %c0_61 = arith.constant 0 : index
    %100 = vector.load %arg7[%c4_60, %c0_61] : memref<9x128xf32, #tpu.memory_space<vmem>>, vector<1x128xf32>
    %101 = vector.broadcast %100 : vector<1x128xf32> to vector<16x128xf32>
    %102 = arith.mulf %79, %101 : vector<16x128xf32>
    %c64_62 = arith.constant 64 : index
    %c0_63 = arith.constant 0 : index
    %103 = vector.load %arg22[%c64_62, %c0_63] : memref<144x128xf32, #tpu.memory_space<vmem>>, vector<16x128xf32>
    tpu.vector_store %arg22[%c64_62, %c0_63], %102 {strides = array<i32>} : memref<144x128xf32, #tpu.memory_space<vmem>>, vector<16x128xf32>,
    %c127_i32 = arith.constant 127 : i32
    %104 = tpu.dynamic_rotate %79 by %c127_i32 dim 1 : vector<16x128xf32>, i32 -> vector<16x128xf32>
    %c5_64 = arith.constant 5 : index
    %c0_65 = arith.constant 0 : index
    %105 = vector.load %arg7[%c5_64, %c0_65] : memref<9x128xf32, #tpu.memory_space<vmem>>, vector<1x128xf32>
    %106 = vector.broadcast %105 : vector<1x128xf32> to vector<16x128xf32>
    %107 = arith.mulf %104, %106 : vector<16x128xf32>
    %c80 = arith.constant 80 : index
    %c0_66 = arith.constant 0 : index
    %108 = vector.load %arg22[%c80, %c0_66] : memref<144x128xf32, #tpu.memory_space<vmem>>, vector<16x128xf32>
    tpu.vector_store %arg22[%c80, %c0_66], %107 {strides = array<i32>} : memref<144x128xf32, #tpu.memory_space<vmem>>, vector<16x128xf32>,
    %c121_i32 = arith.constant 121 : i32
    %109 = tpu.dynamic_rotate %79 by %c121_i32 dim 1 : vector<16x128xf32>, i32 -> vector<16x128xf32>
    %c6_67 = arith.constant 6 : index
    %c0_68 = arith.constant 0 : index
    %110 = vector.load %arg7[%c6_67, %c0_68] : memref<9x128xf32, #tpu.memory_space<vmem>>, vector<1x128xf32>
    %111 = vector.broadcast %110 : vector<1x128xf32> to vector<16x128xf32>
    %112 = arith.mulf %109, %111 : vector<16x128xf32>
    %c96 = arith.constant 96 : index
    %c0_69 = arith.constant 0 : index
    %113 = vector.load %arg22[%c96, %c0_69] : memref<144x128xf32, #tpu.memory_space<vmem>>, vector<16x128xf32>
    tpu.vector_store %arg22[%c96, %c0_69], %112 {strides = array<i32>} : memref<144x128xf32, #tpu.memory_space<vmem>>, vector<16x128xf32>,
    %c120_i32 = arith.constant 120 : i32
    %114 = tpu.dynamic_rotate %79 by %c120_i32 dim 1 : vector<16x128xf32>, i32 -> vector<16x128xf32>
    %c7_70 = arith.constant 7 : index
    %c0_71 = arith.constant 0 : index
    %115 = vector.load %arg7[%c7_70, %c0_71] : memref<9x128xf32, #tpu.memory_space<vmem>>, vector<1x128xf32>
    %116 = vector.broadcast %115 : vector<1x128xf32> to vector<16x128xf32>
    %117 = arith.mulf %114, %116 : vector<16x128xf32>
    %c112 = arith.constant 112 : index
    %c0_72 = arith.constant 0 : index
    %118 = vector.load %arg22[%c112, %c0_72] : memref<144x128xf32, #tpu.memory_space<vmem>>, vector<16x128xf32>
    tpu.vector_store %arg22[%c112, %c0_72], %117 {strides = array<i32>} : memref<144x128xf32, #tpu.memory_space<vmem>>, vector<16x128xf32>,
    %c119_i32 = arith.constant 119 : i32
    %119 = tpu.dynamic_rotate %79 by %c119_i32 dim 1 : vector<16x128xf32>, i32 -> vector<16x128xf32>
    %c8_73 = arith.constant 8 : index
    %c0_74 = arith.constant 0 : index
    %120 = vector.load %arg7[%c8_73, %c0_74] : memref<9x128xf32, #tpu.memory_space<vmem>>, vector<1x128xf32>
    %121 = vector.broadcast %120 : vector<1x128xf32> to vector<16x128xf32>
    %122 = arith.mulf %119, %121 : vector<16x128xf32>
    %c128 = arith.constant 128 : index
    %c0_75 = arith.constant 0 : index
    %123 = vector.load %arg22[%c128, %c0_75] : memref<144x128xf32, #tpu.memory_space<vmem>>, vector<16x128xf32>
    tpu.vector_store %arg22[%c128, %c0_75], %122 {strides = array<i32>} : memref<144x128xf32, #tpu.memory_space<vmem>>, vector<16x128xf32>,
    %c0_76 = arith.constant 0 : index
    %c0_77 = arith.constant 0 : index
    %124 = vector.load %arg8[%c0_76, %c0_77] : memref<32x144xbf16, #tpu.memory_space<vmem>>, vector<32x144xbf16>
    %c0_78 = arith.constant 0 : index
    %c0_79 = arith.constant 0 : index
    %125 = vector.load %arg22[%c0_78, %c0_79] : memref<144x128xf32, #tpu.memory_space<vmem>>, vector<144x128xf32>
    %126 = arith.truncf %125 : vector<144x128xf32> to vector<144x128xbf16>
    %cst_80 = arith.constant dense<0.000000e+00> : vector<32x128xf32>
    %127 = tpu.matmul %124, %126, %cst_80 {dimension_numbers = #tpu.dot_dimension_numbers<[1], [0], [0], [1], [0, 0, 1, 1], [], []>} : vector<32x144xbf16>, vector<144x128xbf16>, vector<32x128xf32> -> vector<32x128xf32>
    %cst_81 = arith.constant dense<0.000000e+00> : vector<32xf32>
    %128 = vector.multi_reduction <add>, %127, %cst_81 [1] : vector<32x128xf32> to vector<32xf32>
    %129 = vector.shape_cast %128 : vector<32xf32> to vector<32x1xf32>
    %cst_82 = arith.constant 1.280000e+02 : f32
    %130 = vector.broadcast %cst_82 : f32 to vector<32x1xf32>
    %131 = arith.divf %129, %130 : vector<32x1xf32>
    %132 = vector.broadcast %131 : vector<32x1xf32> to vector<32x128xf32>
    %133 = arith.subf %127, %132 : vector<32x128xf32>
    %134 = arith.mulf %133, %133 : vector<32x128xf32>
    %cst_83 = arith.constant dense<0.000000e+00> : vector<32xf32>
    %135 = vector.multi_reduction <add>, %134, %cst_83 [1] : vector<32x128xf32> to vector<32xf32>
    %136 = vector.shape_cast %135 : vector<32xf32> to vector<32x1xf32>
    %cst_84 = arith.constant 1.280000e+02 : f32
    %137 = vector.broadcast %cst_84 : f32 to vector<32x1xf32>
    %138 = arith.divf %136, %137 : vector<32x1xf32>
    %c0_85 = arith.constant 0 : index
    %c0_86 = arith.constant 0 : index
    %139 = vector.load %arg9[%c0_85, %c0_86] : memref<32x1xf32, #tpu.memory_space<vmem>>, vector<32x1xf32>
    %cst_87 = arith.constant 9.99999974E-6 : f32
    %140 = vector.broadcast %cst_87 : f32 to vector<32x1xf32>
    %141 = arith.addf %138, %140 : vector<32x1xf32>
    %142 = math.rsqrt %141 : vector<32x1xf32>
    %143 = arith.mulf %139, %142 : vector<32x1xf32>
    %144 = vector.broadcast %143 : vector<32x1xf32> to vector<32x128xf32>
    %145 = arith.mulf %133, %144 : vector<32x128xf32>
    %c0_88 = arith.constant 0 : index
    %c0_89 = arith.constant 0 : index
    %146 = vector.load %arg10[%c0_88, %c0_89] : memref<32x1xf32, #tpu.memory_space<vmem>>, vector<32x1xf32>
    %147 = vector.broadcast %146 : vector<32x1xf32> to vector<32x128xf32>
    %148 = arith.addf %145, %147 : vector<32x128xf32>
    %cst_90 = arith.constant 0.000000e+00 : f32
    %149 = vector.broadcast %cst_90 : f32 to vector<32x128xf32>
    %150 = arith.maximumf %148, %149 : vector<32x128xf32>
    %c0_91 = arith.constant 0 : index
    %c0_92 = arith.constant 0 : index
    %151 = vector.load %arg19[%c0_91, %c0_92] : memref<32x128xf32, #tpu.memory_space<vmem>>, vector<32x128xf32>
    tpu.vector_store %arg19[%c0_91, %c0_92], %150 {strides = array<i32>} : memref<32x128xf32, #tpu.memory_space<vmem>>, vector<32x128xf32>,
    %c127_i32_93 = arith.constant 127 : i32
    %152 = tpu.dynamic_rotate %150 by %c127_i32_93 dim 1 : vector<32x128xf32>, i32 -> vector<32x128xf32>
    %153 = arith.maximumf %150, %152 : vector<32x128xf32>
    %c120_i32_94 = arith.constant 120 : i32
    %154 = tpu.dynamic_rotate %153 by %c120_i32_94 dim 1 : vector<32x128xf32>, i32 -> vector<32x128xf32>
    %155 = arith.maximumf %153, %154 : vector<32x128xf32>
    %156 = arith.truncf %155 : vector<32x128xf32> to vector<32x128xbf16>
    %c0_95 = arith.constant 0 : index
    %c0_96 = arith.constant 0 : index
    %157 = vector.load %arg11[%c0_95, %c0_96] : memref<128x32xbf16, #tpu.memory_space<vmem>>, vector<128x32xbf16>
    %cst_97 = arith.constant dense<0.000000e+00> : vector<32x32xf32>
    %158 = tpu.matmul %156, %157, %cst_97 {dimension_numbers = #tpu.dot_dimension_numbers<[1], [0], [0], [1], [0, 0, 1, 1], [], []>} : vector<32x128xbf16>, vector<128x32xbf16>, vector<32x32xf32> -> vector<32x32xf32>
    %159 = arith.truncf %158 : vector<32x32xf32> to vector<32x32xbf16>
    %c0_98 = arith.constant 0 : index
    %c0_99 = arith.constant 0 : index
    %c0_100 = arith.constant 0 : index
    %160 = vector.load %arg12[%c0_98, %c0_99, %c0_100] : memref<9x32x32xbf16, #tpu.memory_space<vmem>>, vector<1x32x32xbf16>
    %161 = vector.shape_cast %160 : vector<1x32x32xbf16> to vector<32x32xbf16>
    %cst_101 = arith.constant dense<0.000000e+00> : vector<32x32xf32>
    %162 = tpu.matmul %159, %161, %cst_101 {dimension_numbers = #tpu.dot_dimension_numbers<[1], [0], [0], [1], [0, 0, 1, 1], [], []>} : vector<32x32xbf16>, vector<32x32xbf16>, vector<32x32xf32> -> vector<32x32xf32>
    %c0_102 = arith.constant 0 : index
    %c0_103 = arith.constant 0 : index
    %163 = vector.load %arg23[%c0_102, %c0_103] : memref<288x32xf32, #tpu.memory_space<vmem>>, vector<32x32xf32>
    tpu.vector_store %arg23[%c0_102, %c0_103], %162 {strides = array<i32>} : memref<288x32xf32, #tpu.memory_space<vmem>>, vector<32x32xf32>,
    %c1_104 = arith.constant 1 : index
    %c0_105 = arith.constant 0 : index
    %c0_106 = arith.constant 0 : index
    %164 = vector.load %arg12[%c1_104, %c0_105, %c0_106] : memref<9x32x32xbf16, #tpu.memory_space<vmem>>, vector<1x32x32xbf16>
    %165 = vector.shape_cast %164 : vector<1x32x32xbf16> to vector<32x32xbf16>
    %cst_107 = arith.constant dense<0.000000e+00> : vector<32x32xf32>
    %166 = tpu.matmul %159, %165, %cst_107 {dimension_numbers = #tpu.dot_dimension_numbers<[1], [0], [0], [1], [0, 0, 1, 1], [], []>} : vector<32x32xbf16>, vector<32x32xbf16>, vector<32x32xf32> -> vector<32x32xf32>
    %c32_108 = arith.constant 32 : index
    %c0_109 = arith.constant 0 : index
    %167 = vector.load %arg23[%c32_108, %c0_109] : memref<288x32xf32, #tpu.memory_space<vmem>>, vector<32x32xf32>
    tpu.vector_store %arg23[%c32_108, %c0_109], %166 {strides = array<i32>} : memref<288x32xf32, #tpu.memory_space<vmem>>, vector<32x32xf32>,
    %c2_110 = arith.constant 2 : index
    %c0_111 = arith.constant 0 : index
    %c0_112 = arith.constant 0 : index
    %168 = vector.load %arg12[%c2_110, %c0_111, %c0_112] : memref<9x32x32xbf16, #tpu.memory_space<vmem>>, vector<1x32x32xbf16>
    %169 = vector.shape_cast %168 : vector<1x32x32xbf16> to vector<32x32xbf16>
    %cst_113 = arith.constant dense<0.000000e+00> : vector<32x32xf32>
    %170 = tpu.matmul %159, %169, %cst_113 {dimension_numbers = #tpu.dot_dimension_numbers<[1], [0], [0], [1], [0, 0, 1, 1], [], []>} : vector<32x32xbf16>, vector<32x32xbf16>, vector<32x32xf32> -> vector<32x32xf32>
    %c64_114 = arith.constant 64 : index
    %c0_115 = arith.constant 0 : index
    %171 = vector.load %arg23[%c64_114, %c0_115] : memref<288x32xf32, #tpu.memory_space<vmem>>, vector<32x32xf32>
    tpu.vector_store %arg23[%c64_114, %c0_115], %170 {strides = array<i32>} : memref<288x32xf32, #tpu.memory_space<vmem>>, vector<32x32xf32>,
    %c3_116 = arith.constant 3 : index
    %c0_117 = arith.constant 0 : index
    %c0_118 = arith.constant 0 : index
    %172 = vector.load %arg12[%c3_116, %c0_117, %c0_118] : memref<9x32x32xbf16, #tpu.memory_space<vmem>>, vector<1x32x32xbf16>
    %173 = vector.shape_cast %172 : vector<1x32x32xbf16> to vector<32x32xbf16>
    %cst_119 = arith.constant dense<0.000000e+00> : vector<32x32xf32>
    %174 = tpu.matmul %159, %173, %cst_119 {dimension_numbers = #tpu.dot_dimension_numbers<[1], [0], [0], [1], [0, 0, 1, 1], [], []>} : vector<32x32xbf16>, vector<32x32xbf16>, vector<32x32xf32> -> vector<32x32xf32>
    %c96_120 = arith.constant 96 : index
    %c0_121 = arith.constant 0 : index
    %175 = vector.load %arg23[%c96_120, %c0_121] : memref<288x32xf32, #tpu.memory_space<vmem>>, vector<32x32xf32>
    tpu.vector_store %arg23[%c96_120, %c0_121], %174 {strides = array<i32>} : memref<288x32xf32, #tpu.memory_space<vmem>>, vector<32x32xf32>,
    %c4_122 = arith.constant 4 : index
    %c0_123 = arith.constant 0 : index
    %c0_124 = arith.constant 0 : index
    %176 = vector.load %arg12[%c4_122, %c0_123, %c0_124] : memref<9x32x32xbf16, #tpu.memory_space<vmem>>, vector<1x32x32xbf16>
    %177 = vector.shape_cast %176 : vector<1x32x32xbf16> to vector<32x32xbf16>
    %cst_125 = arith.constant dense<0.000000e+00> : vector<32x32xf32>
    %178 = tpu.matmul %159, %177, %cst_125 {dimension_numbers = #tpu.dot_dimension_numbers<[1], [0], [0], [1], [0, 0, 1, 1], [], []>} : vector<32x32xbf16>, vector<32x32xbf16>, vector<32x32xf32> -> vector<32x32xf32>
    %c128_126 = arith.constant 128 : index
    %c0_127 = arith.constant 0 : index
    %179 = vector.load %arg23[%c128_126, %c0_127] : memref<288x32xf32, #tpu.memory_space<vmem>>, vector<32x32xf32>
    tpu.vector_store %arg23[%c128_126, %c0_127], %178 {strides = array<i32>} : memref<288x32xf32, #tpu.memory_space<vmem>>, vector<32x32xf32>,
    %c5_128 = arith.constant 5 : index
    %c0_129 = arith.constant 0 : index
    %c0_130 = arith.constant 0 : index
    %180 = vector.load %arg12[%c5_128, %c0_129, %c0_130] : memref<9x32x32xbf16, #tpu.memory_space<vmem>>, vector<1x32x32xbf16>
    %181 = vector.shape_cast %180 : vector<1x32x32xbf16> to vector<32x32xbf16>
    %cst_131 = arith.constant dense<0.000000e+00> : vector<32x32xf32>
    %182 = tpu.matmul %159, %181, %cst_131 {dimension_numbers = #tpu.dot_dimension_numbers<[1], [0], [0], [1], [0, 0, 1, 1], [], []>} : vector<32x32xbf16>, vector<32x32xbf16>, vector<32x32xf32> -> vector<32x32xf32>
    %c160 = arith.constant 160 : index
    %c0_132 = arith.constant 0 : index
    %183 = vector.load %arg23[%c160, %c0_132] : memref<288x32xf32, #tpu.memory_space<vmem>>, vector<32x32xf32>
    tpu.vector_store %arg23[%c160, %c0_132], %182 {strides = array<i32>} : memref<288x32xf32, #tpu.memory_space<vmem>>, vector<32x32xf32>,
    %c6_133 = arith.constant 6 : index
    %c0_134 = arith.constant 0 : index
    %c0_135 = arith.constant 0 : index
    %184 = vector.load %arg12[%c6_133, %c0_134, %c0_135] : memref<9x32x32xbf16, #tpu.memory_space<vmem>>, vector<1x32x32xbf16>
    %185 = vector.shape_cast %184 : vector<1x32x32xbf16> to vector<32x32xbf16>
    %cst_136 = arith.constant dense<0.000000e+00> : vector<32x32xf32>
    %186 = tpu.matmul %159, %185, %cst_136 {dimension_numbers = #tpu.dot_dimension_numbers<[1], [0], [0], [1], [0, 0, 1, 1], [], []>} : vector<32x32xbf16>, vector<32x32xbf16>, vector<32x32xf32> -> vector<32x32xf32>
    %c192 = arith.constant 192 : index
    %c0_137 = arith.constant 0 : index
    %187 = vector.load %arg23[%c192, %c0_137] : memref<288x32xf32, #tpu.memory_space<vmem>>, vector<32x32xf32>
    tpu.vector_store %arg23[%c192, %c0_137], %186 {strides = array<i32>} : memref<288x32xf32, #tpu.memory_space<vmem>>, vector<32x32xf32>,
    %c7_138 = arith.constant 7 : index
    %c0_139 = arith.constant 0 : index
    %c0_140 = arith.constant 0 : index
    %188 = vector.load %arg12[%c7_138, %c0_139, %c0_140] : memref<9x32x32xbf16, #tpu.memory_space<vmem>>, vector<1x32x32xbf16>
    %189 = vector.shape_cast %188 : vector<1x32x32xbf16> to vector<32x32xbf16>
    %cst_141 = arith.constant dense<0.000000e+00> : vector<32x32xf32>
    %190 = tpu.matmul %159, %189, %cst_141 {dimension_numbers = #tpu.dot_dimension_numbers<[1], [0], [0], [1], [0, 0, 1, 1], [], []>} : vector<32x32xbf16>, vector<32x32xbf16>, vector<32x32xf32> -> vector<32x32xf32>
    %c224 = arith.constant 224 : index
    %c0_142 = arith.constant 0 : index
    %191 = vector.load %arg23[%c224, %c0_142] : memref<288x32xf32, #tpu.memory_space<vmem>>, vector<32x32xf32>
    tpu.vector_store %arg23[%c224, %c0_142], %190 {strides = array<i32>} : memref<288x32xf32, #tpu.memory_space<vmem>>, vector<32x32xf32>,
    %c8_143 = arith.constant 8 : index
    %c0_144 = arith.constant 0 : index
    %c0_145 = arith.constant 0 : index
    %192 = vector.load %arg12[%c8_143, %c0_144, %c0_145] : memref<9x32x32xbf16, #tpu.memory_space<vmem>>, vector<1x32x32xbf16>
    %193 = vector.shape_cast %192 : vector<1x32x32xbf16> to vector<32x32xbf16>
    %cst_146 = arith.constant dense<0.000000e+00> : vector<32x32xf32>
    %194 = tpu.matmul %159, %193, %cst_146 {dimension_numbers = #tpu.dot_dimension_numbers<[1], [0], [0], [1], [0, 0, 1, 1], [], []>} : vector<32x32xbf16>, vector<32x32xbf16>, vector<32x32xf32> -> vector<32x32xf32>
    %c256 = arith.constant 256 : index
    %c0_147 = arith.constant 0 : index
    %195 = vector.load %arg23[%c256, %c0_147] : memref<288x32xf32, #tpu.memory_space<vmem>>, vector<32x32xf32>
    tpu.vector_store %arg23[%c256, %c0_147], %194 {strides = array<i32>} : memref<288x32xf32, #tpu.memory_space<vmem>>, vector<32x32xf32>,
    %c0_148 = arith.constant 0 : index
    %c0_149 = arith.constant 0 : index
    %196 = vector.load %arg13[%c0_148, %c0_149] : memref<32x288xbf16, #tpu.memory_space<vmem>>, vector<32x288xbf16>
    %c0_150 = arith.constant 0 : index
    %c0_151 = arith.constant 0 : index
    %197 = vector.load %arg23[%c0_150, %c0_151] : memref<288x32xf32, #tpu.memory_space<vmem>>, vector<288x32xf32>
    %198 = arith.truncf %197 : vector<288x32xf32> to vector<288x32xbf16>
    %cst_152 = arith.constant dense<0.000000e+00> : vector<32x32xf32>
    %199 = tpu.matmul %196, %198, %cst_152 {dimension_numbers = #tpu.dot_dimension_numbers<[1], [0], [0], [1], [0, 0, 1, 1], [], []>} : vector<32x288xbf16>, vector<288x32xbf16>, vector<32x32xf32> -> vector<32x32xf32>
    %cst_153 = arith.constant dense<0.000000e+00> : vector<32xf32>
    %200 = vector.multi_reduction <add>, %199, %cst_153 [1] : vector<32x32xf32> to vector<32xf32>
    %201 = vector.shape_cast %200 : vector<32xf32> to vector<32x1xf32>
    %cst_154 = arith.constant 3.200000e+01 : f32
    %202 = vector.broadcast %cst_154 : f32 to vector<32x1xf32>
    %203 = arith.divf %201, %202 : vector<32x1xf32>
    %204 = vector.broadcast %203 : vector<32x1xf32> to vector<32x32xf32>
    %205 = arith.subf %199, %204 : vector<32x32xf32>
    %206 = arith.mulf %205, %205 : vector<32x32xf32>
    %cst_155 = arith.constant dense<0.000000e+00> : vector<32xf32>
    %207 = vector.multi_reduction <add>, %206, %cst_155 [1] : vector<32x32xf32> to vector<32xf32>
    %208 = vector.shape_cast %207 : vector<32xf32> to vector<32x1xf32>
    %cst_156 = arith.constant 3.200000e+01 : f32
    %209 = vector.broadcast %cst_156 : f32 to vector<32x1xf32>
    %210 = arith.divf %208, %209 : vector<32x1xf32>
    %c0_157 = arith.constant 0 : index
    %c0_158 = arith.constant 0 : index
    %211 = vector.load %arg14[%c0_157, %c0_158] : memref<32x1xf32, #tpu.memory_space<vmem>>, vector<32x1xf32>
    %cst_159 = arith.constant 9.99999974E-6 : f32
    %212 = vector.broadcast %cst_159 : f32 to vector<32x1xf32>
    %213 = arith.addf %210, %212 : vector<32x1xf32>
    %214 = math.rsqrt %213 : vector<32x1xf32>
    %215 = arith.mulf %211, %214 : vector<32x1xf32>
    %216 = vector.broadcast %215 : vector<32x1xf32> to vector<32x32xf32>
    %217 = arith.mulf %205, %216 : vector<32x32xf32>
    %c0_160 = arith.constant 0 : index
    %c0_161 = arith.constant 0 : index
    %218 = vector.load %arg15[%c0_160, %c0_161] : memref<32x1xf32, #tpu.memory_space<vmem>>, vector<32x1xf32>
    %219 = vector.broadcast %218 : vector<32x1xf32> to vector<32x32xf32>
    %220 = arith.addf %217, %219 : vector<32x32xf32>
    %cst_162 = arith.constant 0.000000e+00 : f32
    %221 = vector.broadcast %cst_162 : f32 to vector<32x32xf32>
    %222 = arith.maximumf %220, %221 : vector<32x32xf32>
    %c0_163 = arith.constant 0 : index
    %c0_164 = arith.constant 0 : index
    %223 = vector.load %arg16[%c0_163, %c0_164] : memref<2x32xf32, #tpu.memory_space<vmem>>, vector<2x32xf32>
    %cst_165 = arith.constant dense<0.000000e+00> : vector<2x32xf32>
    %224 = tpu.matmul %223, %222, %cst_165 {dimension_numbers = #tpu.dot_dimension_numbers<[1], [0], [0], [1], [0, 0, 1, 1], [], []>} : vector<2x32xf32>, vector<32x32xf32>, vector<2x32xf32> -> vector<2x32xf32>
    %c0_166 = arith.constant 0 : index
    %c0_167 = arith.constant 0 : index
    %225 = vector.load %arg17[%c0_166, %c0_167] : memref<2x1xf32, #tpu.memory_space<vmem>>, vector<2x1xf32>
    %226 = vector.broadcast %225 : vector<2x1xf32> to vector<2x32xf32>
    %227 = arith.addf %224, %226 : vector<2x32xf32>
    %c0_168 = arith.constant 0 : index
    %c0_169 = arith.constant 0 : index
    %228 = vector.load %arg20[%c0_168, %c0_169] : memref<2x32xf32, #tpu.memory_space<vmem>>, vector<2x32xf32>
    tpu.vector_store %arg20[%c0_168, %c0_169], %227 {strides = array<i32>} : memref<2x32xf32, #tpu.memory_space<vmem>>, vector<2x32xf32>,
    return
  }
  func.func @transform_0(%arg0: i32) -> (i32, i32) {
    %c0_i32 = arith.constant 0 : i32
    %c0_i32_0 = arith.constant 0 : i32
    %c0_i32_1 = arith.constant 0 : i32
    return %c0_i32, %c0_i32_0 : i32, i32
  }
  func.func @transform_1(%arg0: i32) -> (i32, i32) {
    %c0_i32 = arith.constant 0 : i32
    %c0_i32_0 = arith.constant 0 : i32
    %c0_i32_1 = arith.constant 0 : i32
    return %c0_i32, %c0_i32_0 : i32, i32
  }
  func.func @transform_2(%arg0: i32) -> (i32, i32) {
    %c0_i32 = arith.constant 0 : i32
    %c0_i32_0 = arith.constant 0 : i32
    %c0_i32_1 = arith.constant 0 : i32
    return %c0_i32, %c0_i32_0 : i32, i32
  }
  func.func @transform_3(%arg0: i32) -> (i32, i32) {
    %c0_i32 = arith.constant 0 : i32
    %c0_i32_0 = arith.constant 0 : i32
    %c0_i32_1 = arith.constant 0 : i32
    return %c0_i32, %c0_i32_0 : i32, i32
  }
  func.func @transform_4(%arg0: i32) -> (i32, i32) {
    %c0_i32 = arith.constant 0 : i32
    %c0_i32_0 = arith.constant 0 : i32
    %c0_i32_1 = arith.constant 0 : i32
    return %c0_i32, %c0_i32_0 : i32, i32
  }
  func.func @transform_5(%arg0: i32) -> (i32, i32) {
    %c0_i32 = arith.constant 0 : i32
    %c0_i32_0 = arith.constant 0 : i32
    %c0_i32_1 = arith.constant 0 : i32
    return %c0_i32, %c0_i32_0 : i32, i32
  }
  func.func @transform_6(%arg0: i32) -> (i32, i32) {
    %c0_i32 = arith.constant 0 : i32
    %c0_i32_0 = arith.constant 0 : i32
    %c0_i32_1 = arith.constant 0 : i32
    return %c0_i32, %c0_i32_0 : i32, i32
  }
  func.func @transform_7(%arg0: i32) -> (i32, i32) {
    %c0_i32 = arith.constant 0 : i32
    %c0_i32_0 = arith.constant 0 : i32
    %c0_i32_1 = arith.constant 0 : i32
    return %c0_i32, %c0_i32_0 : i32, i32
  }
  func.func @transform_8(%arg0: i32) -> (i32, i32) {
    %c0_i32 = arith.constant 0 : i32
    %c0_i32_0 = arith.constant 0 : i32
    %c0_i32_1 = arith.constant 0 : i32
    return %c0_i32, %c0_i32_0 : i32, i32
  }
  func.func @transform_9(%arg0: i32) -> (i32, i32) {
    %c0_i32 = arith.constant 0 : i32
    %c0_i32_0 = arith.constant 0 : i32
    %c0_i32_1 = arith.constant 0 : i32
    return %c0_i32, %c0_i32_0 : i32, i32
  }
  func.func @transform_10(%arg0: i32) -> (i32, i32) {
    %c0_i32 = arith.constant 0 : i32
    %c0_i32_0 = arith.constant 0 : i32
    %c0_i32_1 = arith.constant 0 : i32
    return %c0_i32, %c0_i32_0 : i32, i32
  }
  func.func @transform_11(%arg0: i32) -> (i32, i32, i32) {
    %c0_i32 = arith.constant 0 : i32
    %c0_i32_0 = arith.constant 0 : i32
    %c0_i32_1 = arith.constant 0 : i32
    %c0_i32_2 = arith.constant 0 : i32
    return %c0_i32, %c0_i32_0, %c0_i32_1 : i32, i32, i32
  }
  func.func @transform_12(%arg0: i32) -> (i32, i32) {
    %c0_i32 = arith.constant 0 : i32
    %c0_i32_0 = arith.constant 0 : i32
    %c0_i32_1 = arith.constant 0 : i32
    return %c0_i32, %c0_i32_0 : i32, i32
  }
  func.func @transform_13(%arg0: i32) -> (i32, i32) {
    %c0_i32 = arith.constant 0 : i32
    %c0_i32_0 = arith.constant 0 : i32
    %c0_i32_1 = arith.constant 0 : i32
    return %c0_i32, %c0_i32_0 : i32, i32
  }
  func.func @transform_14(%arg0: i32) -> (i32, i32) {
    %c0_i32 = arith.constant 0 : i32
    %c0_i32_0 = arith.constant 0 : i32
    %c0_i32_1 = arith.constant 0 : i32
    return %c0_i32, %c0_i32_0 : i32, i32
  }
  func.func @transform_15(%arg0: i32) -> (i32, i32) {
    %c0_i32 = arith.constant 0 : i32
    %c0_i32_0 = arith.constant 0 : i32
    %c0_i32_1 = arith.constant 0 : i32
    return %c0_i32, %c0_i32_0 : i32, i32
  }
  func.func @transform_16(%arg0: i32) -> (i32, i32) {
    %c0_i32 = arith.constant 0 : i32
    %c0_i32_0 = arith.constant 0 : i32
    %c0_i32_1 = arith.constant 0 : i32
    return %c0_i32, %c0_i32_0 : i32, i32
  }
  func.func @transform_17(%arg0: i32) -> (i32, i32) {
    %c0_i32 = arith.constant 0 : i32
    %c0_i32_0 = arith.constant 0 : i32
    %c0_i32_1 = arith.constant 0 : i32
    return %c0_i32, %c0_i32_0 : i32, i32
  }
  func.func @transform_18(%arg0: i32) -> (i32, i32) {
    %c0_i32 = arith.constant 0 : i32
    %c0_i32_0 = arith.constant 0 : i32
    %c0_i32_1 = arith.constant 0 : i32
    return %c0_i32, %c0_i32_0 : i32, i32
  }
  func.func @transform_19(%arg0: i32) -> (i32, i32) {
    %c0_i32 = arith.constant 0 : i32
    %c0_i32_0 = arith.constant 0 : i32
    %c0_i32_1 = arith.constant 0 : i32
    return %c0_i32, %c0_i32_0 : i32, i32
  }
}

</mosaic_0001>

<bundles_post_ra>
// kernel: encoder_forward.1
= control target key start
LH: loop header
LB: loop body
LE: loop exit
PB: predicated region body
PF: predicated region fallthrough
CT: control target
= control target key end

     0   :  { %s3192_s21 = smov 16   ;;  %s3194_s26 = smov 15   ;;  %v3199_v4 = vmov 0   ;;  %v72_v5 = vlaneseq  ;;  %vm515_vm8 = vcmask 1043456   ;;  %vm511_vm9 = vcmask 588800   ;;  %s4081_s0 = inlined_call_operand.vmem [shape: f32[8,512], index: 0, kind: input, shape index: {}]   ;;  %s4082_s2 = inlined_call_operand.vmem [shape: bf16[16,72], index: 2, kind: input, shape index: {}]   ;;  %s4083_s1 = inlined_call_operand.vmem [shape: f32[9,512], index: 1, kind: input, shape index: {}]   ;;  %s4084_s3 = inlined_call_operand.vmem [shape: f32[16,1], index: 3, kind: input, shape index: {}]   ;;  %s4085_s4 = inlined_call_operand.vmem [shape: f32[16,1], index: 4, kind: input, shape index: {}]   ;;  %s4086_s17 = inlined_call_operand.vmem [shape: f32[16,512], index: 17, kind: output, shape index: {0}]   ;;  %s4087_s5 = inlined_call_operand.vmem [shape: bf16[512,128], index: 5, kind: input, shape index: {}]   ;;  %s4088_s6 = inlined_call_operand.vmem [shape: f32[9,128], index: 6, kind: input, shape index: {}]   ;;  %s4089_s7 = inlined_call_operand.vmem [shape: bf16[32,144], index: 7, kind: input, shape index: {}]   ;;  %s4090_s9 = inlined_call_operand.vmem [shape: f32[32,1], index: 9, kind: input, shape index: {}]   ;;  %s4091_s8 = inlined_call_operand.vmem [shape: f32[32,1], index: 8, kind: input, shape index: {}]   ;;  %s4092_s18 = inlined_call_operand.vmem [shape: f32[32,128], index: 18, kind: output, shape index: {1}]   ;;  %s4093_s10 = inlined_call_operand.vmem [shape: bf16[128,32], index: 10, kind: input, shape index: {}]   ;;  %s4094_s11 = inlined_call_operand.vmem [shape: bf16[9,32,32], index: 11, kind: input, shape index: {}]   ;;  %s4095_s12 = inlined_call_operand.vmem [shape: bf16[32,288], index: 12, kind: input, shape index: {}]   ;;  %s4096_s14 = inlined_call_operand.vmem [shape: f32[32,1], index: 14, kind: input, shape index: {}]   ;;  %s4097_s13 = inlined_call_operand.vmem [shape: f32[32,1], index: 13, kind: input, shape index: {}]   ;;  %s4098_s16 = inlined_call_operand.vmem [shape: f32[2,1], index: 16, kind: input, shape index: {}]   ;;  %s4099_s15 = inlined_call_operand.vmem [shape: f32[2,32], index: 15, kind: input, shape index: {}]   ;;  %s4100_s19 = inlined_call_operand.vmem [shape: f32[2,32], index: 19, kind: output, shape index: {2}]  }
   0x1   :  { %4104 = sst [smem:[#allocation5_spill]] %s4081_s0  ;;  %s3195_s27 = smov 1   ;;  %560 = vmatprep.mubr.bf16.mxu0 %v3199_v4  ;;  %603 = vmatprep.mubr.bf16.mxu1 %v3199_v4  ;;  %vm1285_vm10 = vcmask 130048   ;;  %vm1607_vm11 = vcmask 261120   ;;  %vm3208_vm12 = vmmov 0   ;;  %vm2616_vm13 = vcmask 254976  }
   0x2   :  { %4105 = sst [smem:[#allocation6_spill]] %s4082_s2  ;;  %s4108_s20 = sld [smem:[#allocation5_spill]]  ;;  %3037 = vset.pattern.permute.xlu1 %v3199_v4  ;;  %3038 = vset.pattern.permute.xlu0 %v3199_v4  ;;  %v82_v6 = vshrl.u32 %v72_v5, 7  ;;  %v3378_v7 = vand.u32 127, %v72_v5 }
   0x3   :  { %4106 = sst [smem:[#allocation7_spill]] %s4083_s1  ;;  %s3193_s2 = smov 17  }
   0x4   :  { %4107 = sst [smem:[#allocation8_spill]] %s4084_s3  ;;  %s3196_s28 = smov 127   ;;  %v3380_v8 = vsub.s32 1, %v82_v6  ;;  %vm74_vm0 = vcmp.lt.s32.totalorder %v3378_v7, 17  ;;  %vm117_vm1 = vcmp.lt.s32.totalorder %v3378_v7, 16  ;;  %v3390_v13 = vsub.s32 0, %v82_v6 }
   0x5   :  { %s3197_s29 = smov 113   ;;  %s3198_s0 = smov 112   ;;  %v3398_v20 = vsub.s32 2, %v82_v6  ;;  %v3400_v21 = vsub.s32 3, %v82_v6  ;;  %vm161_vm2 = vcmp.lt.s32.totalorder %v3378_v7, 15  ;;  %vm205_vm3 = vcmp.lt.s32.totalorder %v3378_v7, 1 }
   0x6   :  { %s3200_s30 = smov 111   ;;  %vm280_vm4 = vcmp.lt.s32.totalorder %v3378_v7, 127  ;;  %vm324_vm5 = vcmp.lt.s32.totalorder %v3378_v7, 113  ;;  %vm368_vm6 = vcmp.lt.s32.totalorder %v3378_v7, 112  ;;  %vm412_vm7 = vcmp.lt.s32.totalorder %v3378_v7, 111  ;;  %s3201_s23 = smov 9  }
   0x7   :  { %s3202_s24 = smov 8   ;;  %s3203_s25 = smov 7  }
   0x8   :  { %v3313_v0 = vld [vmem:[%s4108_s20] sm:$0xff]  ;;  %v3320_v1 = vld [vmem:[%s4108_s20 + $0x8] sm:$0xff]  ;;  %v3327_v2 = vld [vmem:[%s4108_s20 + $0x18] sm:$0xff] }
   0x9   :  { %109 = vrot.lane.b32.xlu1 %v3313_v0, %s3192_s21  ;;  %64 = vrot.lane.b32.xlu0 %v3313_v0, %s3193_s2  ;;  %v3334_v3 = vld [vmem:[%s4108_s20 + $0x10] sm:$0xff]  ;;  %s4111_s20 = sld [smem:[#allocation8_spill]] }
   0xd   :  { %111 = vrot.lane.b32.xlu1 %v3320_v1, %s3192_s21  ;;  %66 = vrot.lane.b32.xlu0 %v3320_v1, %s3193_s2 }
  0x11   :  { %115 = vrot.lane.b32.xlu1 %v3327_v2, %s3192_s21  ;;  %70 = vrot.lane.b32.xlu0 %v3327_v2, %s3193_s2 }
  0x15   :  { %113 = vrot.lane.b32.xlu1 %v3334_v3, %s3192_s21  ;;  %68 = vrot.lane.b32.xlu0 %v3334_v3, %s3193_s2  ;;  %s4109_s2 = sld [smem:[#allocation7_spill]] }
  0x19   :  { %155 = vrot.lane.b32.xlu1 %v3320_v1, %s3194_s26  ;;  %153 = vrot.lane.b32.xlu0 %v3313_v0, %s3194_s26 }
  0x1b   :  { %v79_v9 = vld [vmem:[%s4109_s2] ss:$8 sm:$0xf]  ;;  %v2630_v10 = vld [vmem:[%s4109_s2 + $0x1] ss:$8 sm:$0xf] }
  0x1c   :  { %v88_v14 = vrot.slane %v79_v9, %v3380_v8  ;;  %v132_v15 = vrot.slane %v2630_v10, %v3380_v8  ;;  %v84_v22 = vrot.slane %v79_v9, %v3390_v13  ;;  %v128_v25 = vrot.slane %v2630_v10, %v3390_v13  ;;  %v2631_v48 = vld [vmem:[%s4109_s2 + $0x2] ss:$8 sm:$0xf]  ;;  %v2632_v49 = vld [vmem:[%s4109_s2 + $0x3] ss:$8 sm:$0xf] }
  0x1d   :  { %199 = vrot.lane.b32.xlu1 %v3320_v1, %s3195_s27  ;;  %197 = vrot.lane.b32.xlu0 %v3313_v0, %s3195_s27  ;;  %v92_v31 = vrot.slane %v79_v9, %v3398_v20  ;;  %v96_v32 = vrot.slane %v79_v9, %v3400_v21  ;;  %v140_v35 = vrot.slane %v2630_v10, %v3400_v21 }
  0x1e   :  { %v136_v36 = vrot.slane %v2630_v10, %v3398_v20  ;;  %v176_v54 = vrot.slane %v2631_v48, %v3380_v8  ;;  %v220_v55 = vrot.slane %v2632_v49, %v3380_v8  ;;  %v216_v62 = vrot.slane %v2632_v49, %v3390_v13  ;;  %v2633_v10 = vld [vmem:[%s4109_s2 + $0x4] ss:$8 sm:$0xf] }
  0x1f   :  { %v172_v63 = vrot.slane %v2631_v48, %v3390_v13 }
  0x21   :  { %203 = vrot.lane.b32.xlu1 %v3327_v2, %s3195_s27  ;;  %159 = vrot.lane.b32.xlu0 %v3327_v2, %s3194_s26 }
  0x25   :  { %201 = vrot.lane.b32.xlu1 %v3334_v3, %s3195_s27  ;;  %157 = vrot.lane.b32.xlu0 %v3334_v3, %s3194_s26  ;;  %s4110_s26 = sld [smem:[#allocation6_spill]] }
  0x29   :  { %276 = vrot.lane.b32.xlu1 %v3334_v3, %s3196_s28  ;;  %274 = vrot.lane.b32.xlu0 %v3320_v1, %s3196_s28 }
  0x2d   :  { %278 = vrot.lane.b32.xlu1 %v3327_v2, %s3196_s28  ;;  %272 = vrot.lane.b32.xlu0 %v3313_v0, %s3196_s28 }
  0x31   :  { %320 = vrot.lane.b32.xlu1 %v3334_v3, %s3197_s29  ;;  %318 = vrot.lane.b32.xlu0 %v3320_v1, %s3197_s29 }
  0x35   :  { %364 = vrot.lane.b32.xlu1 %v3334_v3, %s3198_s0  ;;  %362 = vrot.lane.b32.xlu0 %v3320_v1, %s3198_s0 }
  0x39   :  { %360 = vrot.lane.b32.xlu1 %v3313_v0, %s3198_s0  ;;  %316 = vrot.lane.b32.xlu0 %v3313_v0, %s3197_s29 }
  0x3d   :  { %366 = vrot.lane.b32.xlu1 %v3327_v2, %s3198_s0  ;;  %322 = vrot.lane.b32.xlu0 %v3327_v2, %s3197_s29 }
  0x41   :  { %406 = vrot.lane.b32.xlu1 %v3320_v1, %s3200_s30  ;;  %404 = vrot.lane.b32.xlu0 %v3313_v0, %s3200_s30 }
  0x45   :  { %410 = vrot.lane.b32.xlu1 %v3327_v2, %s3200_s30  ;;  %408 = vrot.lane.b32.xlu0 %v3334_v3, %s3200_s30 }
  0x7b   :  { %v110_v11 = vpop.permute.xlu1 %109  ;;  %v65_v12 = vpop.permute.xlu0 %64 }
  0x7f   :  { %v112_v16 = vpop.permute.xlu1 %111  ;;  %v67_v17 = vpop.permute.xlu0 %66 }
  0x80   :  { %v77_v18 = vsel %vm74_vm0, %v65_v12, %v67_v17  ;;  %v120_v19 = vsel %vm117_vm1, %v110_v11, %v112_v16 }
  0x81   :  { %v102_v23 = vmul.f32 %v88_v14, %v77_v18  ;;  %v146_v24 = vmul.f32 %v132_v15, %v120_v19  ;;  %v224_v14 = vrot.slane %v2632_v49, %v3398_v20  ;;  %v228_v15 = vrot.slane %v2632_v49, %v3400_v21 }
  0x82   :  { %v180_v19 = vrot.slane %v2631_v48, %v3398_v20 }
  0x83   :  { %v116_v26 = vpop.permute.xlu1 %115  ;;  %v71_v27 = vpop.permute.xlu0 %70  ;;  %v487_v28 = vpack.c.bf16 %v146_v24, %v102_v23  ;;  %v251_v23 = vrot.slane %v2633_v10, %v3380_v8 }
  0x84   :  { %v121_v29 = vsel %vm117_vm1, %v116_v26, %v110_v11  ;;  %v78_v30 = vsel %vm74_vm0, %v71_v27, %v65_v12 }
  0x85   :  { %v101_v33 = vmul.f32 %v84_v22, %v78_v30  ;;  %528 = vmatprep.subr.bf16.mxu0 %v487_v28  ;;  %v145_v34 = vmul.f32 %v128_v25, %v121_v29  ;;  %v184_v22 = vrot.slane %v2631_v48, %v3400_v21 }
  0x87   :  { %v114_v37 = vpop.permute.xlu1 %113  ;;  %v69_v38 = vpop.permute.xlu0 %68  ;;  %v486_v39 = vpack.c.bf16 %v145_v34, %v101_v33 }
  0x88   :  { %v119_v40 = vsel %vm117_vm1, %v112_v16, %v114_v37  ;;  %v75_v41 = vsel %vm74_vm0, %v69_v38, %v71_v27  ;;  %v76_v42 = vsel %vm74_vm0, %v67_v17, %v69_v38  ;;  %v118_v43 = vsel %vm117_vm1, %v114_v37, %v116_v26  ;;  %v2634_v16 = vld [vmem:[%s4109_s2 + $0x5] ss:$8 sm:$0xf] }
  0x89   :  { %v103_v44 = vmul.f32 %v92_v31, %v76_v42  ;;  %529 = vmatpush1.bf16.msra.mxu0 %v486_v39  ;;  %v104_v45 = vmul.f32 %v96_v32, %v75_v41  ;;  %v148_v46 = vmul.f32 %v140_v35, %v118_v43  ;;  %v147_v47 = vmul.f32 %v136_v36, %v119_v40 }
  0x8a   :  { %v295_v27 = vrot.slane %v2634_v16, %v3380_v8  ;;  %v265_v36 = vmul.f32 %v251_v23, %v3320_v1  ;;  %v247_v37 = vrot.slane %v2633_v10, %v3390_v13  ;;  %v259_v42 = vrot.slane %v2633_v10, %v3400_v21 }
  0x8b   :  { %v156_v50 = vpop.permute.xlu1 %155  ;;  %v154_v51 = vpop.permute.xlu0 %153  ;;  %v489_v52 = vpack.c.bf16 %v148_v46, %v104_v45  ;;  %v488_v53 = vpack.c.bf16 %v147_v47, %v103_v44  ;;  %v255_v43 = vrot.slane %v2633_v10, %v3398_v20  ;;  %v299_v46 = vrot.slane %v2634_v16, %v3398_v20 }
  0x8c   :  { %v164_v56 = vsel %vm161_vm2, %v154_v51, %v156_v50  ;;  %v291_v47 = vrot.slane %v2634_v16, %v3390_v13  ;;  %v303_v1 = vrot.slane %v2634_v16, %v3400_v21 }
  0x8d   :  { %571 = vmatprep.subr.bf16.mxu1 %v489_v52  ;;  %v190_v60 = vmul.f32 %v176_v54, %v164_v56  ;;  %v267_v52 = vmul.f32 %v259_v42, %v3327_v2  ;;  %v2636_v2 = vld [vmem:[%s4109_s2 + $0x7] ss:$8 sm:$0xf] }
  0x8e   :  { %572 = vmatpush1.bf16.msra.mxu1 %v488_v53  ;;  %v266_v53 = vmul.f32 %v255_v43, %v3334_v3  ;;  %v379_v16 = vrot.slane %v2636_v2, %v3390_v13 }
  0x8f   :  { %v200_v57 = vpop.permute.xlu1 %199  ;;  %v198_v58 = vpop.permute.xlu0 %197 }
  0x90   :  { %v208_v59 = vsel %vm205_vm3, %v198_v58, %v200_v57 }
  0x91   :  { %v234_v61 = vmul.f32 %v220_v55, %v208_v59 }
  0x93   :  { %v204_v5 = vpop.permute.xlu1 %203  ;;  %v160_v6 = vpop.permute.xlu0 %159  ;;  %v491_v9 = vpack.c.bf16 %v234_v61, %v190_v60 }
  0x94   :  { %v209_v11 = vsel %vm205_vm3, %v204_v5, %v198_v58  ;;  %v165_v12 = vsel %vm161_vm2, %v160_v6, %v154_v51  ;;  %v264_v51 = vmul.f32 %v247_v37, %v3313_v0  ;;  %v2635_v0 = vld [vmem:[%s4109_s2 + $0x6] ss:$8 sm:$0xf] }
  0x95   :  { %v233_v17 = vmul.f32 %v216_v62, %v209_v11  ;;  %v189_v18 = vmul.f32 %v172_v63, %v165_v12  ;;  %530 = vmatprep.subr.bf16.mxu0 %v491_v9 }
  0x97   :  { %v202_v24 = vpop.permute.xlu1 %201  ;;  %v158_v25 = vpop.permute.xlu0 %157  ;;  %v490_v26 = vpack.c.bf16 %v233_v17, %v189_v18  ;;  %v335_v17 = vrot.slane %v2635_v0, %v3390_v13 }
  0x98   :  { %v206_v28 = vsel %vm205_vm3, %v202_v24, %v204_v5  ;;  %v207_v29 = vsel %vm205_vm3, %v200_v57, %v202_v24  ;;  %v162_v30 = vsel %vm161_vm2, %v158_v25, %v160_v6  ;;  %v163_v31 = vsel %vm161_vm2, %v156_v50, %v158_v25 }
  0x99   :  { %v235_v32 = vmul.f32 %v224_v14, %v207_v29  ;;  %v236_v33 = vmul.f32 %v228_v15, %v206_v28  ;;  %v191_v34 = vmul.f32 %v180_v19, %v163_v31  ;;  %v192_v35 = vmul.f32 %v184_v22, %v162_v30  ;;  %531 = vmatpush1.bf16.msra.mxu0 %v490_v26 }
  0x9a   :  { %v339_v5 = vrot.slane %v2635_v0, %v3380_v8  ;;  %v383_v6 = vrot.slane %v2636_v2, %v3380_v8  ;;  %v387_v25 = vrot.slane %v2636_v2, %v3398_v20  ;;  %v391_v26 = vrot.slane %v2636_v2, %v3400_v21 }
  0x9b   :  { %v277_v38 = vpop.permute.xlu1 %276  ;;  %v275_v39 = vpop.permute.xlu0 %274  ;;  %v493_v40 = vpack.c.bf16 %v236_v33, %v192_v35  ;;  %v492_v41 = vpack.c.bf16 %v235_v32, %v191_v34  ;;  %v343_v30 = vrot.slane %v2635_v0, %v3398_v20  ;;  %v347_v31 = vrot.slane %v2635_v0, %v3400_v21 }
  0x9c   :  { %v282_v44 = vsel %vm280_vm4, %v275_v39, %v277_v38 }
  0x9d   :  { %v309_v45 = vmul.f32 %v295_v27, %v282_v44  ;;  %573 = vmatprep.subr.bf16.mxu1 %v493_v40  ;;  %v2637_v27 = vld [vmem:[%s4109_s2 + $0x20] ss:$8 sm:$0xf]  ;;  %s3205_s2 = smov 120  }
  0x9e   :  { %574 = vmatpush1.bf16.msra.mxu1 %v492_v41  ;;  %v423_v35 = vrot.slane %v2637_v27, %v3390_v13 }
  0x9f   :  { %v279_v48 = vpop.permute.xlu1 %278  ;;  %v273_v49 = vpop.permute.xlu0 %272  ;;  %v495_v50 = vpack.c.bf16 %v309_v45, %v265_v36 }
  0xa0   :  { %v281_v54 = vsel %vm280_vm4, %v277_v38, %v279_v48  ;;  %v283_v55 = vsel %vm280_vm4, %v273_v49, %v275_v39  ;;  %v284_v56 = vsel %vm280_vm4, %v279_v48, %v273_v49  ;;  %v435_v48 = vrot.slane %v2637_v27, %v3400_v21 }
  0xa1   :  { %v310_v57 = vmul.f32 %v299_v46, %v281_v54  ;;  %v308_v58 = vmul.f32 %v291_v47, %v283_v55  ;;  %v311_v59 = vmul.f32 %v303_v1, %v284_v56  ;;  %532 = vmatprep.subr.bf16.mxu0 %v495_v50  ;;  %v427_v49 = vrot.slane %v2637_v27, %v3380_v8 }
  0xa2   :  { %v431_v50 = vrot.slane %v2637_v27, %v3398_v20 }
  0xa3   :  { %v321_v3 = vpop.permute.xlu1 %320  ;;  %v319_v60 = vpop.permute.xlu0 %318  ;;  %v494_v61 = vpack.c.bf16 %v308_v58, %v264_v51  ;;  %v497_v62 = vpack.c.bf16 %v311_v59, %v267_v52  ;;  %v496_v63 = vpack.c.bf16 %v310_v57, %v266_v53 }
  0xa4   :  { %v326_v9 = vsel %vm324_vm5, %v319_v60, %v321_v3 }
  0xa5   :  { %533 = vmatpush1.bf16.msra.mxu0 %v494_v61  ;;  %575 = vmatprep.subr.bf16.mxu1 %v497_v62  ;;  %v353_v14 = vmul.f32 %v339_v5, %v326_v9 }
  0xa6   :  { %576 = vmatpush1.bf16.msra.mxu1 %v496_v63 }
  0xa7   :  { %v365_v10 = vpop.permute.xlu1 %364  ;;  %v363_v11 = vpop.permute.xlu0 %362 }
  0xa8   :  { %v370_v12 = vsel %vm368_vm6, %v363_v11, %v365_v10 }
  0xa9   :  { %v397_v15 = vmul.f32 %v383_v6, %v370_v12 }
  0xab   :  { %v361_v18 = vpop.permute.xlu1 %360  ;;  %v317_v19 = vpop.permute.xlu0 %316  ;;  %v499_v22 = vpack.c.bf16 %v397_v15, %v353_v14 }
  0xac   :  { %v371_v23 = vsel %vm368_vm6, %v361_v18, %v363_v11  ;;  %v327_v24 = vsel %vm324_vm5, %v317_v19, %v319_v60 }
  0xad   :  { %v396_v28 = vmul.f32 %v379_v16, %v371_v23  ;;  %v352_v29 = vmul.f32 %v335_v17, %v327_v24  ;;  %534 = vmatprep.subr.bf16.mxu0 %v499_v22 }
  0xaf   :  { %v367_v32 = vpop.permute.xlu1 %366  ;;  %v323_v33 = vpop.permute.xlu0 %322  ;;  %v498_v34 = vpack.c.bf16 %v396_v28, %v352_v29 }
  0xb0   :  { %v369_v36 = vsel %vm368_vm6, %v365_v10, %v367_v32  ;;  %v372_v37 = vsel %vm368_vm6, %v367_v32, %v361_v18  ;;  %v325_v38 = vsel %vm324_vm5, %v321_v3, %v323_v33  ;;  %v328_v39 = vsel %vm324_vm5, %v323_v33, %v317_v19  ;;  %v3099_v3 = vld [vmem:[%s4110_s26] sm:$0xff]  }
  0xb1   :  { %v398_v40 = vmul.f32 %v387_v25, %v369_v36  ;;  %v399_v41 = vmul.f32 %v391_v26, %v372_v37  ;;  %v354_v42 = vmul.f32 %v343_v30, %v325_v38  ;;  %v355_v43 = vmul.f32 %v347_v31, %v328_v39  ;;  %535 = vmatpush1.bf16.msra.mxu0 %v498_v34 }
  0xb3   :  { %v407_v44 = vpop.permute.xlu1 %406  ;;  %v405_v45 = vpop.permute.xlu0 %404  ;;  %v501_v13 = vpack.c.bf16 %v399_v41, %v355_v43  ;;  %v500_v46 = vpack.c.bf16 %v398_v40, %v354_v42 }
  0xb4   :  { %v415_v47 = vsel %vm412_vm7, %v405_v45, %v407_v44 }
  0xb5   :  { %v440_v1 = vmul.f32 %v423_v35, %v415_v47  ;;  %577 = vmatprep.subr.bf16.mxu1 %v501_v13 }
  0xb6   :  { %578 = vmatpush1.bf16.msra.mxu1 %v500_v46 }
  0xb7   :  { %v411_v51 = vpop.permute.xlu1 %410  ;;  %v409_v52 = vpop.permute.xlu0 %408  ;;  %v502_v56 = vpack.c.bf16 %v440_v1, %v440_v1 }
  0xb8   :  { %v416_v53 = vsel %vm412_vm7, %v411_v51, %v405_v45  ;;  %v413_v54 = vsel %vm412_vm7, %v409_v52, %v411_v51  ;;  %v414_v55 = vsel %vm412_vm7, %v407_v44, %v409_v52 }
  0xb9   :  { %v443_v57 = vmul.f32 %v435_v48, %v416_v53  ;;  %v441_v58 = vmul.f32 %v427_v49, %v414_v55  ;;  %v442_v21 = vmul.f32 %v431_v50, %v413_v54  ;;  %v517_v0 = vsel %vm515_vm8, %v502_v56, 0  ;;  %v655_v50 = vld [vmem:[%s4111_s20] sm:$0xff]  ;;  %v656_v53 = vld [vmem:[%s4111_s20 + $0x8] sm:$0xff] }
  0xba   :  { %v681_v55 = vld [vmem:[%s4085_s4] sm:$0xff] }
  0xbb   :  { %v505_v8 = vpack.c.bf16 %v443_v57, %v443_v57  ;;  %v503_v59 = vpack.c.bf16 %v441_v58, %v441_v58  ;;  %v504_v20 = vpack.c.bf16 %v442_v21, %v442_v21  ;;  %v682_v57 = vld [vmem:[%s4085_s4 + $0x8] sm:$0xff]  ;;  %s3204_s4 = smov 121  }
  0xbd   :  { %2639 = vmatprep.subr.msk.bf16.mxu0 %vm515_vm8, %v503_v59  ;;  %2641 = vmatprep.subr.msk.bf16.mxu1 %vm515_vm8, %v505_v8  ;;  %v523_v2 = vsel %vm515_vm8, %v504_v20, 0 }
  0xbe   :  { %537 = vmatpush1.bf16.msra.mxu0 %v517_v0  ;;  %580 = vmatpush1.bf16.msra.mxu1 %v523_v2 }
  0xc1   :  { %2640 = vmatmul.mubr.msk.bf16.vlgmr.msra.gmra.mrb[0].mxu0 %vm511_vm9, %v3099_v3  ;;  %2642 = vmatmul.mubr.msk.bf16.vlgmr.msra.gmra.mrb[0].mxu1 %vm511_vm9, %v3099_v3 }
 0x194   :  { %v562_v60 = vpop.f32.mrb[0].mxu0  ;;  %v605_v61 = vpop.f32.mrb[0].mxu1 }
 0x195   :  { %v564_v62 = vpop.f32.mrb[1].mxu0  ;;  %v607_v63 = vpop.f32.mrb[1].mxu1 }
 0x196   :  { %v614_v5 = vadd.f32 %v564_v62, %v562_v60  ;;  %v566_v6 = vpop.f32.mrb[2].mxu0  ;;  %v609_v9 = vpop.f32.mrb[2].mxu1 }
 0x197   :  { %v568_v10 = vpop.f32.mrb[3].mxu0  ;;  %v611_v11 = vpop.f32.mrb[3].mxu1 }
 0x198   :  { %v619_v12 = vadd.f32 %v568_v10, %v566_v6  ;;  %v615_v14 = vadd.f32 %v614_v5, %v605_v61 }
 0x19a   :  { %v616_v15 = vadd.f32 %v615_v14, %v607_v63  ;;  %v620_v16 = vadd.f32 %v619_v12, %v609_v9 }
 0x19c   :  { %617 = vadd.xlane.f32.xlu0 %v616_v15  ;;  %v621_v17 = vadd.f32 %v620_v16, %v611_v11 }
 0x19e   :  { %622 = vadd.xlane.f32.xlu1 %v621_v17 }
 0x229   :  { %v618_v18 = vpop.xlane.xlu0 %617 }
 0x22a   :  { %v625_v19 = vmul.f32 0.001953125, %v618_v18 }
 0x22b   :  { %v623_v22 = vpop.xlane.xlu1 %622 }
 0x22c   :  { %v627_v23 = vsub.f32 %v562_v60, %v625_v19  ;;  %v628_v24 = vsub.f32 %v564_v62, %v625_v19  ;;  %v626_v25 = vmul.f32 0.001953125, %v623_v22  ;;  %v629_v26 = vsub.f32 %v605_v61, %v625_v19 }
 0x22d   :  { %v630_v27 = vsub.f32 %v607_v63, %v625_v19 }
 0x22e   :  { %v631_v28 = vsub.f32 %v566_v6, %v626_v25  ;;  %v632_v29 = vsub.f32 %v568_v10, %v626_v25  ;;  %v635_v30 = vmul.f32 %v627_v23, %v627_v23  ;;  %v636_v31 = vmul.f32 %v628_v24, %v628_v24 }
 0x22f   :  { %v633_v32 = vsub.f32 %v609_v9, %v626_v25  ;;  %v637_v33 = vmul.f32 %v629_v26, %v629_v26  ;;  %v638_v37 = vmul.f32 %v630_v27, %v630_v27  ;;  %v634_v39 = vsub.f32 %v611_v11, %v626_v25 }
 0x230   :  { %v643_v34 = vadd.f32 %v636_v31, %v635_v30  ;;  %v639_v35 = vmul.f32 %v631_v28, %v631_v28  ;;  %v640_v36 = vmul.f32 %v632_v29, %v632_v29  ;;  %v3101_v30 = vld [vmem:[%s4087_s5 + $0xc0] sm:$0xff]  }
 0x231   :  { %v641_v40 = vmul.f32 %v633_v32, %v633_v32  ;;  %v642_v44 = vmul.f32 %v634_v39, %v634_v39  ;;  %v3102_v31 = vld [vmem:[%s4087_s5] sm:$0xff]   ;;  %2797 = vmatprep.subr.bf16.mxu1 %v3101_v30 }
 0x232   :  { %v644_v38 = vadd.f32 %v643_v34, %v637_v33  ;;  %v648_v41 = vadd.f32 %v640_v36, %v639_v35  ;;  %v3103_v33 = vld [vmem:[%s4087_s5 + $0x80] sm:$0xff]   ;;  %v3104_v34 = vld [vmem:[%s4087_s5 + $0x48] sm:$0xff]  }
 0x233   :  { %2798 = vmatpush3.bf16.msra.mxu1 %v3103_v33  ;;  %v3105_v35 = vld [vmem:[%s4087_s5 + $0xc8] sm:$0xff]  }
 0x234   :  { %v645_v42 = vadd.f32 %v644_v38, %v638_v37  ;;  %v649_v43 = vadd.f32 %v648_v41, %v641_v40  ;;  %v3106_v36 = vld [vmem:[%s4087_s5 + $0x8] sm:$0xff]   ;;  %2799 = vmatprep.subr.bf16.mxu1 %v3105_v35  ;;  %v3108_v38 = vld [vmem:[%s4087_s5 + $0x50] sm:$0xff]  }
 0x235   :  { %v3107_v37 = vld [vmem:[%s4087_s5 + $0x88] sm:$0xff]   ;;  %v3110_v40 = vld [vmem:[%s4087_s5 + $0x10] sm:$0xff]  }
 0x236   :  { %646 = vadd.xlane.f32.xlu0 %v645_v42  ;;  %v650_v45 = vadd.f32 %v649_v43, %v642_v44  ;;  %v3111_v41 = vld [vmem:[%s4087_s5 + $0x90] sm:$0xff]   ;;  %v3112_v42 = vld [vmem:[%s4087_s5 + $0x58] sm:$0xff]  }
 0x237   :  { %2800 = vmatpush3.bf16.msra.mxu1 %v3107_v37  ;;  %v3113_v43 = vld [vmem:[%s4087_s5 + $0xd8] sm:$0xff]  }
 0x238   :  { %v3114_v44 = vld [vmem:[%s4087_s5 + $0x18] sm:$0xff]  }
 0x23a   :  { %651 = vadd.xlane.f32.xlu0 %v650_v45  ;;  %v3115_v45 = vld [vmem:[%s4087_s5 + $0x98] sm:$0xff]  }
 0x2c3   :  { %v647_v13 = vpop.xlane.xlu0 %646 }
 0x2c4   :  { %v653_v46 = vmul.f32 0.001953125, %v647_v13  ;;  %v3116_v13 = vld [vmem:[%s4087_s5 + $0x60] sm:$0xff]  }
 0x2c6   :  { %v657_v47 = vadd.f32 1e-05, %v653_v46  ;;  %v3117_v46 = vld [vmem:[%s4087_s5 + $0xe0] sm:$0xff]  }
 0x2c7   :  { %v652_v1 = vpop.xlane.xlu0 %651 }
 0x2c8   :  { %3172 = vrsqrt.f32 %v657_v47  ;;  %v654_v48 = vmul.f32 0.001953125, %v652_v1  ;;  %v3118_v47 = vld [vmem:[%s4087_s5 + $0x20] sm:$0xff]  }
 0x2c9   :  { %v3119_v1 = vld [vmem:[%s4087_s5 + $0xa0] sm:$0xff]  }
 0x2ca   :  { %v658_v49 = vadd.f32 1e-05, %v654_v48 }
 0x2cc   :  { %3174 = vrsqrt.f32 %v658_v49  ;;  %v3120_v49 = vld [vmem:[%s4087_s5 + $0x68] sm:$0xff]  }
 0x2d2   :  { %v3173_v51 = vpop.eup %3172 }
 0x2d3   :  { %v661_v52 = vmul.f32 %v3173_v51, %v655_v50  ;;  %v3121_v50 = vld [vmem:[%s4087_s5 + $0xe8] sm:$0xff]  }
 0x2d4   :  { %v3122_v51 = vld [vmem:[%s4087_s5 + $0x28] sm:$0xff]  }
 0x2d5   :  { %665 = vperm.xlu1 %3037, %v661_v52   ;;  %v3123_v52 = vld [vmem:[%s4087_s5 + $0xa8] sm:$0xff]  }
 0x2d6   :  { %v3175_v54 = vpop.eup %3174 }
 0x2d7   :  { %v662_v56 = vmul.f32 %v3175_v54, %v656_v53 }
 0x2d9   :  { %685 = vperm.xlu1 %3037, %v681_v55   ;;  %670 = vperm.xlu0 %3038, %v662_v56  }
 0x2dd   :  { %690 = vperm.xlu1 %3037, %v682_v57  }
 0x354   :  { %v666_v58 = vpop.permute.xlu1 %665 }
 0x355   :  { %v673_v21 = vmul.f32 %v666_v58, %v627_v23  ;;  %v674_v8 = vmul.f32 %v666_v58, %v628_v24  ;;  %v675_v59 = vmul.f32 %v666_v58, %v629_v26  ;;  %v676_v20 = vmul.f32 %v666_v58, %v630_v27  ;;  %v3124_v58 = vld [vmem:[%s4087_s5 + $0x70] sm:$0xff]  }
 0x358   :  { %v671_v0 = vpop.permute.xlu0 %670  ;;  %v686_v2 = vpop.permute.xlu1 %685 }
 0x359   :  { %v693_v3 = vadd.f32 %v686_v2, %v673_v21  ;;  %v694_v60 = vadd.f32 %v686_v2, %v674_v8  ;;  %v695_v61 = vadd.f32 %v686_v2, %v675_v59  ;;  %v696_v62 = vadd.f32 %v686_v2, %v676_v20  ;;  %v3125_v21 = vld [vmem:[%s4087_s5 + $0xf0] sm:$0xff]  }
 0x35a   :  { %v677_v63 = vmul.f32 %v671_v0, %v631_v28  ;;  %v678_v5 = vmul.f32 %v671_v0, %v632_v29  ;;  %v679_v6 = vmul.f32 %v671_v0, %v633_v32  ;;  %v680_v9 = vmul.f32 %v671_v0, %v634_v39  ;;  %v3100_v29 = vld [vmem:[%s4087_s5 + $0x40] sm:$0xff]   ;;  %v3109_v39 = vld [vmem:[%s4087_s5 + $0xd0] sm:$0xff]  }
 0x35b   :  { %v3542_v10 = vmax.f32 %v693_v3, 0.0  ;;  %v3544_v11 = vmax.f32 %v694_v60, 0.0  ;;  %v3546_v12 = vmax.f32 %v695_v61, 0.0  ;;  %v3548_v14 = vmax.f32 %v696_v62, 0.0  ;;  %2775 = vmatprep.subr.bf16.mxu0 %v3100_v29  ;;  %2801 = vmatprep.subr.bf16.mxu1 %v3109_v39  ;;  %v3126_v20 = vld [vmem:[%s4087_s5 + $0x30] sm:$0xff]  }
 0x35c   :  { %v691_v15 = vpop.permute.xlu1 %690  ;;  %2776 = vmatpush3.bf16.msra.mxu0 %v3102_v31  ;;  %2802 = vmatpush3.bf16.msra.mxu1 %v3111_v41  ;;  %v3127_v0 = vld [vmem:[%s4087_s5 + $0xb0] sm:$0xff]  }
 0x35d   :  { %v697_v16 = vadd.f32 %v691_v15, %v677_v63  ;;  %v698_v17 = vadd.f32 %v691_v15, %v678_v5  ;;  %v699_v18 = vadd.f32 %v691_v15, %v679_v6  ;;  %v700_v19 = vadd.f32 %v691_v15, %v680_v9  ;;  %709 = vst [vmem:[%s4086_s17] sm:$0xff] %v3542_v10  ;;  %v3128_v5 = vld [vmem:[%s4087_s5 + $0x78] sm:$0xff]  }
 0x35e   :  { %710 = vst [vmem:[%s4086_s17 + $0x8] sm:$0xff] %v3544_v11  ;;  %711 = vst [vmem:[%s4086_s17 + $0x10] sm:$0xff] %v3546_v12  ;;  %2777 = vmatprep.subr.bf16.mxu0 %v3104_v34  ;;  %2803 = vmatprep.subr.bf16.mxu1 %v3113_v43  ;;  %v3129_v6 = vld [vmem:[%s4087_s5 + $0xf8] sm:$0xff]  }
 0x35f   :  { %712 = vst [vmem:[%s4086_s17 + $0x18] sm:$0xff] %v3548_v14  ;;  %v3566_v22 = vmax.f32 %v697_v16, 0.0  ;;  %v3568_v23 = vmax.f32 %v698_v17, 0.0  ;;  %v3570_v24 = vmax.f32 %v699_v18, 0.0  ;;  %v3572_v25 = vmax.f32 %v700_v19, 0.0  ;;  %v3130_v9 = vld [vmem:[%s4087_s5 + $0x38] sm:$0xff]  }
 0x360   :  { %2778 = vmatpush3.bf16.msra.mxu0 %v3106_v36  ;;  %2804 = vmatpush3.bf16.msra.mxu1 %v3115_v45  ;;  %v3131_v16 = vld [vmem:[%s4087_s5 + $0xb8] sm:$0xff]  }
 0x361   :  { %713 = vst [vmem:[%s4086_s17 + $0x20] sm:$0xff] %v3566_v22  ;;  %714 = vst [vmem:[%s4086_s17 + $0x28] sm:$0xff] %v3568_v23  ;;  %v3039_v26 = vpack.i.bf16 %v3566_v22, %v3542_v10  ;;  %v3044_v27 = vpack.i.bf16 %v3568_v23, %v3544_v11  ;;  %v3049_v28 = vpack.i.bf16 %v3570_v24, %v3546_v12  ;;  %2779 = vmatprep.subr.bf16.mxu0 %v3108_v38 }
 0x362   :  { %715 = vst [vmem:[%s4086_s17 + $0x30] sm:$0xff] %v3570_v24  ;;  %716 = vst [vmem:[%s4086_s17 + $0x38] sm:$0xff] %v3572_v25  ;;  %v3054_v32 = vpack.i.bf16 %v3572_v25, %v3548_v14  ;;  %2805 = vmatprep.subr.bf16.mxu1 %v3117_v46 }
 0x363   :  { %3040 = vrot.lane.b32.xlu1 %v3039_v26, %s3196_s28 }
 0x364   :  { %2780 = vmatpush3.bf16.msra.mxu0 %v3110_v40  ;;  %2806 = vmatpush3.bf16.msra.mxu1 %v3119_v1 }
 0x365   :  { %2781 = vmatprep.subr.bf16.mxu0 %v3112_v42  ;;  %2807 = vmatprep.subr.bf16.mxu1 %v3121_v50 }
 0x367   :  { %3045 = vrot.lane.b32.xlu1 %v3044_v27, %s3196_s28 }
 0x368   :  { %2782 = vmatpush3.bf16.msra.mxu0 %v3114_v44  ;;  %2808 = vmatpush3.bf16.msra.mxu1 %v3123_v52 }
 0x369   :  { %2783 = vmatprep.subr.bf16.mxu0 %v3116_v13  ;;  %2809 = vmatprep.subr.bf16.mxu1 %v3125_v21 }
 0x36b   :  { %3050 = vrot.lane.b32.xlu1 %v3049_v28, %s3196_s28 }
 0x36c   :  { %2784 = vmatpush3.bf16.msra.mxu0 %v3118_v47  ;;  %2810 = vmatpush3.bf16.msra.mxu1 %v3127_v0 }
 0x36d   :  { %2785 = vmatprep.subr.bf16.mxu0 %v3120_v49  ;;  %2811 = vmatprep.subr.bf16.mxu1 %v3129_v6 }
 0x36f   :  { %3055 = vrot.lane.b32.xlu1 %v3054_v32, %s3196_s28 }
 0x370   :  { %2786 = vmatpush3.bf16.msra.mxu0 %v3122_v51  ;;  %2812 = vmatpush3.bf16.msra.mxu1 %v3131_v16 }
 0x371   :  { %2787 = vmatprep.subr.bf16.mxu0 %v3124_v58 }
 0x374   :  { %2788 = vmatpush3.bf16.msra.mxu0 %v3126_v20 }
 0x375   :  { %2789 = vmatprep.subr.bf16.mxu0 %v3128_v5 }
 0x378   :  { %2790 = vmatpush3.bf16.msra.mxu0 %v3130_v9 }
 0x379   :  { %1292 = vmatprep.subr.bf16.mxu0 %v3199_v4 }
 0x3d5   :  { %v3041_v48 = vpop.permute.xlu1 %3040 }
 0x3d6   :  { %v3043_v54 = vunpack.i.h.bf16 %v3041_v48  ;;  %v3042_v55 = vunpack.i.l.bf16 %v3041_v48 }
 0x3d9   :  { %v3046_v53 = vpop.permute.xlu1 %3045 }
 0x3da   :  { %v3048_v56 = vunpack.i.h.bf16 %v3046_v53  ;;  %v3047_v57 = vunpack.i.l.bf16 %v3046_v53 }
 0x3dc   :  { %v737_v8 = vsel %vm280_vm4, %v3042_v55, %v3047_v57  ;;  %v738_v59 = vsel %vm280_vm4, %v3043_v54, %v3048_v56 }
 0x3dd   :  { %v3051_v2 = vpop.permute.xlu1 %3050  ;;  %v3691_v3 = vmax.f32 %v3542_v10, %v737_v8  ;;  %v3694_v60 = vmax.f32 %v3566_v22, %v738_v59 }
 0x3de   :  { %v3053_v61 = vunpack.i.h.bf16 %v3051_v2  ;;  %v3052_v62 = vunpack.i.l.bf16 %v3051_v2 }
 0x3df   :  { %v3059_v63 = vpack.i.bf16 %v3694_v60, %v3691_v3 }
 0x3e0   :  { %v735_v10 = vsel %vm280_vm4, %v3047_v57, %v3052_v62  ;;  %v736_v15 = vsel %vm280_vm4, %v3048_v56, %v3053_v61 }
 0x3e1   :  { %v3056_v17 = vpop.permute.xlu1 %3055  ;;  %3060 = vrot.lane.b32.xlu1 %v3059_v63, %s3198_s0  ;;  %v742_v18 = vmax.f32 %v3544_v11, %v735_v10  ;;  %v746_v19 = vmax.f32 %v3568_v23, %v736_v15  ;;  %v2679_v15 = vld [vmem:[%s4088_s6 + $0x4] ss:$0 sm:$0xff] }
 0x3e2   :  { %v3058_v22 = vunpack.i.h.bf16 %v3056_v17  ;;  %v3057_v26 = vunpack.i.l.bf16 %v3056_v17 }
 0x3e3   :  { %v3064_v27 = vpack.i.bf16 %v746_v19, %v742_v18 }
 0x3e4   :  { %v733_v28 = vsel %vm280_vm4, %v3052_v62, %v3057_v26  ;;  %v734_v29 = vsel %vm280_vm4, %v3053_v61, %v3058_v22  ;;  %v739_v11 = vsel %vm280_vm4, %v3057_v26, %v3042_v55  ;;  %v740_v23 = vsel %vm280_vm4, %v3058_v22, %v3043_v54  ;;  %v3132_v22 = vld [vmem:[%s4089_s7 + $0x4] ss:$8 sps:$4 sm:$0xff]   ;;  %v2675_v26 = vld [vmem:[%s4088_s6] ss:$0 sm:$0xff] }
 0x3e5   :  { %3065 = vrot.lane.b32.xlu1 %v3064_v27, %s3198_s0  ;;  %v743_v30 = vmax.f32 %v3546_v12, %v733_v28  ;;  %v747_v31 = vmax.f32 %v3570_v24, %v734_v29  ;;  %v744_v32 = vmax.f32 %v3548_v14, %v739_v11  ;;  %v748_v33 = vmax.f32 %v3572_v25, %v740_v23  ;;  %v2676_v23 = vld [vmem:[%s4088_s6 + $0x1] ss:$0 sm:$0xff] }
 0x3e7   :  { %v3069_v34 = vpack.i.bf16 %v747_v31, %v743_v30  ;;  %v3074_v35 = vpack.i.bf16 %v748_v33, %v744_v32 }
 0x3e9   :  { %3070 = vrot.lane.b32.xlu0 %v3069_v34, %s3198_s0  ;;  %3075 = vrot.lane.b32.xlu1 %v3074_v35, %s3198_s0  ;;  %v2677_v35 = vld [vmem:[%s4088_s6 + $0x2] ss:$0 sm:$0xff] }
 0x453   :  { %v3061_v36 = vpop.permute.xlu1 %3060 }
 0x454   :  { %v3063_v38 = vunpack.i.h.bf16 %v3061_v36  ;;  %v3062_v39 = vunpack.i.l.bf16 %v3061_v36 }
 0x457   :  { %v3066_v37 = vpop.permute.xlu1 %3065 }
 0x458   :  { %v3068_v40 = vunpack.i.h.bf16 %v3066_v37  ;;  %v3067_v41 = vunpack.i.l.bf16 %v3066_v37 }
 0x45a   :  { %v769_v12 = vsel %vm368_vm6, %v3062_v39, %v3067_v41  ;;  %v770_v14 = vsel %vm368_vm6, %v3063_v38, %v3068_v40 }
 0x45b   :  { %v3071_v24 = vpop.permute.xlu0 %3070  ;;  %v3076_v25 = vpop.permute.xlu1 %3075  ;;  %v773_v13 = vmax.f32 %v3691_v3, %v769_v12  ;;  %v777_v46 = vmax.f32 %v3694_v60, %v770_v14 }
 0x45c   :  { %v3073_v42 = vunpack.i.h.bf16 %v3071_v24  ;;  %v3072_v43 = vunpack.i.l.bf16 %v3071_v24  ;;  %v3078_v44 = vunpack.i.h.bf16 %v3076_v25  ;;  %v3077_v45 = vunpack.i.l.bf16 %v3076_v25 }
 0x45d   :  { %v781_v59 = vpack.c.bf16 %v777_v46, %v773_v13  ;;  %v2680_v13 = vld [vmem:[%s4088_s6 + $0x5] ss:$0 sm:$0xff] }
 0x45e   :  { %v767_v47 = vsel %vm368_vm6, %v3067_v41, %v3072_v43  ;;  %v768_v1 = vsel %vm368_vm6, %v3068_v40, %v3073_v42  ;;  %v766_v48 = vsel %vm368_vm6, %v3073_v42, %v3078_v44  ;;  %v765_v49 = vsel %vm368_vm6, %v3072_v43, %v3077_v45  ;;  %v2678_v41 = vld [vmem:[%s4088_s6 + $0x3] ss:$0 sm:$0xff] }
 0x45f   :  { %v779_v50 = vmax.f32 %v747_v31, %v766_v48  ;;  %v771_v51 = vsel %vm368_vm6, %v3077_v45, %v3062_v39  ;;  %v772_v52 = vsel %vm368_vm6, %v3078_v44, %v3063_v38  ;;  %v775_v53 = vmax.f32 %v743_v30, %v765_v49  ;;  %v2681_v49 = vld [vmem:[%s4088_s6 + $0x6] ss:$0 sm:$0xff] }
 0x460   :  { %v774_v54 = vmax.f32 %v742_v18, %v767_v47  ;;  %v778_v55 = vmax.f32 %v746_v19, %v768_v1  ;;  %v776_v56 = vmax.f32 %v744_v32, %v771_v51  ;;  %v780_v57 = vmax.f32 %v748_v33, %v772_v52 }
 0x461   :  { %v783_v58 = vpack.c.bf16 %v779_v50, %v775_v53 }
 0x462   :  { %v782_v21 = vpack.c.bf16 %v778_v55, %v774_v54  ;;  %v784_v8 = vpack.c.bf16 %v780_v57, %v776_v56  ;;  %v2682_v55 = vld [vmem:[%s4088_s6 + $0x7] ss:$0 sm:$0xff] }
 0x464   :  { %1073 = vmatprep.mubr.bf16.mxu0 %v782_v21  ;;  %1114 = vmatprep.mubr.bf16.mxu1 %v784_v8  ;;  %v2683_v8 = vld [vmem:[%s4088_s6 + $0x8] ss:$0 sm:$0xff] }
 0x465   :  { %1074 = vmatmul.mubr.bf16.vlgmr.msra.gmra.mrb[4].mxu0 %v781_v59  ;;  %1115 = vmatmul.mubr.bf16.vlgmr.msra.gmra.mrb[4].mxu1 %v783_v58 }
 0x466   :  { %2688 = vmatprep.mubr.msk.bf16.mxu0 %vm1285_vm10, %v3132_v22 }
 0x538   :  { %v2791_v20 = vpop.f32.mrb[4].mxu0  ;;  %v2813_v0 = vpop.f32.mrb[4].mxu1 }
 0x539   :  { %v2792_v2 = vpop.f32.mrb[5].mxu0  ;;  %v2814_v3 = vpop.f32.mrb[5].mxu1 }
 0x53a   :  { %v2793_v60 = vadd.f32 %v2792_v2, %v2791_v20  ;;  %v2815_v7 = vadd.f32 %v2814_v3, %v2813_v0  ;;  %v2794_v61 = vpop.f32.mrb[6].mxu0  ;;  %v2816_v62 = vpop.f32.mrb[6].mxu1 }
 0x53b   :  { %v2795_v63 = vpop.f32.mrb[7].mxu0  ;;  %v2817_v5 = vpop.f32.mrb[7].mxu1 }
 0x53c   :  { %v1117_v6 = vadd.f32 %v2815_v7, %v2793_v60  ;;  %v2796_v9 = vadd.f32 %v2795_v63, %v2794_v61  ;;  %v2818_v10 = vadd.f32 %v2817_v5, %v2816_v62  ;;  %v3134_v60 = vld [vmem:[%s4089_s7] ss:$8 sps:$4 sm:$0xff]   ;;  %v3135_v7 = vld [vmem:[%s4089_s7 + $0x14] ss:$8 sps:$4 sm:$0xff]   ;;  %v3137_v61 = vld [vmem:[%s4089_s7 + $0x10] ss:$8 sps:$4 sm:$0xff]  }
 0x53e   :  { %v1120_v16 = vadd.f32 %v2818_v10, %v2796_v9  ;;  %1123 = vrot.lane.b32.xlu0 %v1117_v6, %s3201_s23  ;;  %v3754_v17 = vmul.f32 %v2679_v15, %v1117_v6 }
 0x540   :  { %1125 = vrot.lane.b32.xlu1 %v1120_v16, %s3201_s23  ;;  %v3756_v18 = vmul.f32 %v2679_v15, %v1120_v16 }
 0x542   :  { %1136 = vrot.lane.b32.xlu0 %v1117_v6, %s3202_s24  ;;  %v1262_v19 = vpack.c.bf16 %v3756_v18, %v3754_v17 }
 0x544   :  { %1138 = vrot.lane.b32.xlu1 %v1120_v16, %s3202_s24 }
 0x546   :  { %1149 = vrot.lane.b32.xlu0 %v1117_v6, %s3203_s25 }
 0x548   :  { %1151 = vrot.lane.b32.xlu1 %v1120_v16, %s3203_s25 }
 0x54a   :  { %1162 = vrot.lane.b32.xlu0 %v1117_v6, %s3195_s27 }
 0x54c   :  { %1164 = vrot.lane.b32.xlu1 %v1120_v16, %s3195_s27  ;;  %s3206_s27 = smov 119  }
 0x54e   :  { %1184 = vrot.lane.b32.xlu0 %v1117_v6, %s3196_s28 }
 0x550   :  { %1186 = vrot.lane.b32.xlu1 %v1120_v16, %s3196_s28 }
 0x552   :  { %1197 = vrot.lane.b32.xlu0 %v1117_v6, %s3204_s4 }
 0x554   :  { %1199 = vrot.lane.b32.xlu1 %v1120_v16, %s3204_s4 }
 0x556   :  { %1210 = vrot.lane.b32.xlu0 %v1117_v6, %s3205_s2 }
 0x558   :  { %1212 = vrot.lane.b32.xlu1 %v1120_v16, %s3205_s2 }
 0x55a   :  { %1223 = vrot.lane.b32.xlu0 %v1117_v6, %s3206_s27 }
 0x55c   :  { %1225 = vrot.lane.b32.xlu1 %v1120_v16, %s3206_s27 }
 0x5b0   :  { %v1124_v27 = vpop.permute.xlu0 %1123 }
 0x5b1   :  { %v1132_v29 = vmul.f32 %v2675_v26, %v1124_v27 }
 0x5b2   :  { %v1126_v28 = vpop.permute.xlu1 %1125 }
 0x5b3   :  { %v1133_v11 = vmul.f32 %v2675_v26, %v1126_v28 }
 0x5b4   :  { %v1137_v30 = vpop.permute.xlu0 %1136 }
 0x5b5   :  { %v1258_v31 = vpack.c.bf16 %v1133_v11, %v1132_v29  ;;  %v1145_v33 = vmul.f32 %v2676_v23, %v1137_v30 }
 0x5b6   :  { %v1139_v32 = vpop.permute.xlu1 %1138 }
 0x5b7   :  { %v1146_v34 = vmul.f32 %v2676_v23, %v1139_v32  ;;  %1293 = vmatpush1.bf16.msra.mxu0 %v1258_v31 }
 0x5b8   :  { %v1150_v36 = vpop.permute.xlu0 %1149  ;;  %1294 = vmatprep.subr.bf16.mxu0 %v3199_v4 }
 0x5b9   :  { %v1259_v37 = vpack.c.bf16 %v1146_v34, %v1145_v33  ;;  %v1158_v39 = vmul.f32 %v2677_v35, %v1150_v36  ;;  %v1414_v36 = vld [vmem:[%s4090_s9] sm:$0xff] }
 0x5ba   :  { %v1152_v38 = vpop.permute.xlu1 %1151 }
 0x5bb   :  { %v1159_v40 = vmul.f32 %v2677_v35, %v1152_v38  ;;  %1295 = vmatpush1.bf16.msra.mxu0 %v1259_v37  ;;  %v1415_v35 = vld [vmem:[%s4090_s9 + $0x8] sm:$0xff] }
 0x5bc   :  { %v1163_v12 = vpop.permute.xlu0 %1162  ;;  %1296 = vmatprep.subr.bf16.mxu0 %v3199_v4 }
 0x5bd   :  { %v1260_v14 = vpack.c.bf16 %v1159_v40, %v1158_v39  ;;  %v1171_v25 = vmul.f32 %v2678_v41, %v1163_v12 }
 0x5be   :  { %v1165_v24 = vpop.permute.xlu1 %1164 }
 0x5bf   :  { %v1172_v42 = vmul.f32 %v2678_v41, %v1165_v24  ;;  %1297 = vmatpush1.bf16.msra.mxu0 %v1260_v14 }
 0x5c0   :  { %v1185_v43 = vpop.permute.xlu0 %1184  ;;  %1298 = vmatprep.subr.bf16.mxu0 %v3199_v4 }
 0x5c1   :  { %v1261_v44 = vpack.c.bf16 %v1172_v42, %v1171_v25  ;;  %v1193_v48 = vmul.f32 %v2680_v13, %v1185_v43 }
 0x5c2   :  { %v1187_v45 = vpop.permute.xlu1 %1186 }
 0x5c3   :  { %1299 = vmatpush1.bf16.msra.mxu0 %v1261_v44  ;;  %v1194_v47 = vmul.f32 %v2680_v13, %v1187_v45  ;;  %v1374_v44 = vld [vmem:[%s4091_s8] sm:$0xff] }
 0x5c4   :  { %v1198_v46 = vpop.permute.xlu0 %1197  ;;  %1300 = vmatprep.subr.bf16.mxu0 %v3199_v4 }
 0x5c5   :  { %v1263_v50 = vpack.c.bf16 %v1194_v47, %v1193_v48  ;;  %v1206_v54 = vmul.f32 %v2681_v49, %v1198_v46  ;;  %v1375_v46 = vld [vmem:[%s4091_s8 + $0x8] sm:$0xff] }
 0x5c6   :  { %v1200_v1 = vpop.permute.xlu1 %1199 }
 0x5c7   :  { %1301 = vmatpush1.bf16.msra.mxu0 %v1262_v19  ;;  %v1207_v51 = vmul.f32 %v2681_v49, %v1200_v1  ;;  %v1416_v49 = vld [vmem:[%s4090_s9 + $0x10] sm:$0xff] }
 0x5c8   :  { %1302 = vmatprep.subr.bf16.mxu0 %v3199_v4  ;;  %v1211_v52 = vpop.permute.xlu0 %1210 }
 0x5c9   :  { %v1264_v56 = vpack.c.bf16 %v1207_v51, %v1206_v54  ;;  %v1219_v21 = vmul.f32 %v2682_v55, %v1211_v52 }
 0x5ca   :  { %v1213_v53 = vpop.permute.xlu1 %1212 }
 0x5cb   :  { %1303 = vmatpush1.bf16.msra.mxu0 %v1263_v50  ;;  %v1220_v57 = vmul.f32 %v2682_v55, %v1213_v53  ;;  %v1376_v50 = vld [vmem:[%s4091_s8 + $0x10] sm:$0xff]  ;;  %v1377_v53 = vld [vmem:[%s4091_s8 + $0x18] sm:$0xff] }
 0x5cc   :  { %1304 = vmatprep.subr.bf16.mxu0 %v3199_v4  ;;  %v1224_v59 = vpop.permute.xlu0 %1223 }
 0x5cd   :  { %v1265_v20 = vpack.c.bf16 %v1220_v57, %v1219_v21  ;;  %v1232_v2 = vmul.f32 %v2683_v8, %v1224_v59 }
 0x5ce   :  { %v1226_v58 = vpop.permute.xlu1 %1225 }
 0x5cf   :  { %1305 = vmatpush1.bf16.msra.mxu0 %v1264_v56  ;;  %v1233_v0 = vmul.f32 %v2683_v8, %v1226_v58  ;;  %v1417_v56 = vld [vmem:[%s4090_s9 + $0x18] sm:$0xff] }
 0x5d0   :  { %1306 = vmatprep.subr.bf16.mxu0 %v3199_v4 }
 0x5d1   :  { %v1266_v3 = vpack.c.bf16 %v1233_v0, %v1232_v2 }
 0x5d3   :  { %1307 = vmatpush1.bf16.msra.mxu0 %v1265_v20 }
 0x5d4   :  { %1308 = vmatprep.subr.bf16.mxu0 %v3199_v4 }
 0x5d7   :  { %1309 = vmatpush1.bf16.msra.mxu0 %v1266_v3 }
 0x5da   :  { %1325 = vmatmul.mubr.bf16.vlgmr.msra.gmra.mrb[8].mxu0 %v3134_v60 }
 0x5db   :  { %2689 = vmatprep.mubr.msk.bf16.mxu0 %vm1285_vm10, %v3135_v7 }
 0x5e2   :  { %1333 = vmatmul.mubr.bf16.gmra.mrb[12].mxu0 %v3137_v61 }
 0x6ad   :  { %v1326_v62 = vpop.f32.mrb[8].mxu0 }
 0x6ae   :  { %1341 = vadd.xlane.f32.xlu0 %v1326_v62  ;;  %v1328_v4 = vpop.f32.mrb[9].mxu0 }
 0x6af   :  { %v1329_v63 = vpop.f32.mrb[10].mxu0 }
 0x6b0   :  { %1343 = vadd.xlane.f32.xlu1 %v1329_v63  ;;  %v1331_v5 = vpop.f32.mrb[11].mxu0 }
 0x6b5   :  { %v1334_v6 = vpop.f32.mrb[12].mxu0 }
 0x6b6   :  { %1345 = vadd.xlane.f32.xlu0 %v1334_v6  ;;  %v1336_v9 = vpop.f32.mrb[13].mxu0 }
 0x6b7   :  { %v1337_v10 = vpop.f32.mrb[14].mxu0 }
 0x6b8   :  { %v1339_v15 = vpop.f32.mrb[15].mxu0 }
 0x6ba   :  { %1347 = vadd.xlane.f32.xlu0 %v1337_v10 }
 0x73b   :  { %v1342_v16 = vpop.xlane.xlu0 %1341 }
 0x73c   :  { %v1350_v17 = vmul.f32 0.0078125, %v1342_v16  ;;  %v3138_v16 = vld [vmem:[%s4093_s10] sm:$0xff]  }
 0x73d   :  { %v1344_v18 = vpop.xlane.xlu1 %1343  ;;  %2902 = vmatprep.subr.bf16.mxu1 %v3138_v16 }
 0x73e   :  { %v1354_v19 = vsub.f32 %v1326_v62, %v1350_v17  ;;  %v1351_v22 = vmul.f32 0.0078125, %v1344_v18  ;;  %v3139_v17 = vld [vmem:[%s4093_s10 + $0x8] sm:$0xff]   ;;  %2903 = vmatpush3.bf16.msra.mxu1 %v3138_v16 }
 0x73f   :  { %2904 = vmatprep.subr.bf16.mxu1 %v3139_v17 }
 0x740   :  { %v3812_v26 = vsub.f32 %v1329_v63, %v1351_v22  ;;  %v1358_v27 = vmul.f32 %v1354_v19, %v1354_v19 }
 0x742   :  { %1362 = vadd.xlane.f32.xlu1 %v1358_v27  ;;  %v1359_v28 = vmul.f32 %v3812_v26, %v3812_v26  ;;  %2905 = vmatpush3.bf16.msra.mxu1 %v3139_v17  ;;  %v3142_v27 = vld [vmem:[%s4093_s10 + $0x20] sm:$0xff]  }
 0x743   :  { %v1346_v29 = vpop.xlane.xlu0 %1345 }
 0x744   :  { %v1352_v11 = vmul.f32 0.0078125, %v1346_v29  ;;  %1364 = vadd.xlane.f32.xlu0 %v1359_v28  ;;  %v3143_v28 = vld [vmem:[%s4093_s10 + $0x28] sm:$0xff]  }
 0x746   :  { %v3816_v23 = vsub.f32 %v1334_v6, %v1352_v11  ;;  %v3144_v11 = vld [vmem:[%s4093_s10 + $0x30] sm:$0xff]  }
 0x747   :  { %v1348_v30 = vpop.xlane.xlu0 %1347 }
 0x748   :  { %v1353_v31 = vmul.f32 0.0078125, %v1348_v30  ;;  %v1360_v32 = vmul.f32 %v3816_v23, %v3816_v23 }
 0x74a   :  { %v3820_v33 = vsub.f32 %v1337_v10, %v1353_v31  ;;  %1366 = vadd.xlane.f32.xlu1 %v1360_v32 }
 0x74c   :  { %v1361_v34 = vmul.f32 %v3820_v33, %v3820_v33 }
 0x74e   :  { %1368 = vadd.xlane.f32.xlu0 %v1361_v34  ;;  %v3145_v34 = vld [vmem:[%s4093_s10 + $0x38] sm:$0xff]  }
 0x75b   :  { %1425 = vperm.xlu1 %3037, %v1415_v35  }
 0x764   :  { %1420 = vperm.xlu0 %3038, %v1414_v36  }
 0x7cf   :  { %v1363_v37 = vpop.xlane.xlu1 %1362 }
 0x7d0   :  { %v1370_v38 = vmul.f32 0.0078125, %v1363_v37 }
 0x7d1   :  { %v1365_v39 = vpop.xlane.xlu0 %1364 }
 0x7d2   :  { %v1378_v40 = vadd.f32 1e-05, %v1370_v38  ;;  %v1371_v41 = vmul.f32 0.0078125, %v1365_v39  ;;  %v3146_v38 = vld [vmem:[%s4094_s11] sm:$0xff]   ;;  %v3147_v39 = vld [vmem:[%s4094_s11 + $0x8] sm:$0xff]  }
 0x7d3   :  { %2922 = vmatprep.subr.bf16.mxu0 %v3146_v38 }
 0x7d4   :  { %3176 = vrsqrt.f32 %v1378_v40  ;;  %v1379_v12 = vadd.f32 1e-05, %v1371_v41  ;;  %2923 = vmatpush3.bf16.msra.mxu0 %v3146_v38 }
 0x7d5   :  { %2924 = vmatprep.subr.bf16.mxu0 %v3147_v39 }
 0x7d6   :  { %3178 = vrsqrt.f32 %v1379_v12  ;;  %v3148_v12 = vld [vmem:[%s4094_s11 + $0x10] sm:$0xff]  }
 0x7d7   :  { %v1367_v14 = vpop.xlane.xlu1 %1366 }
 0x7d8   :  { %v1372_v24 = vmul.f32 0.0078125, %v1367_v14  ;;  %2925 = vmatpush3.bf16.msra.mxu0 %v3147_v39 }
 0x7da   :  { %v1380_v25 = vadd.f32 1e-05, %v1372_v24 }
 0x7db   :  { %v1369_v42 = vpop.xlane.xlu0 %1368  ;;  %v1426_v57 = vpop.permute.xlu1 %1425 }
 0x7dc   :  { %3180 = vrsqrt.f32 %v1380_v25  ;;  %v1373_v43 = vmul.f32 0.0078125, %v1369_v42 }
 0x7de   :  { %v3177_v45 = vpop.eup %3176  ;;  %v1381_v13 = vadd.f32 1e-05, %v1373_v43 }
 0x7df   :  { %v1386_v47 = vmul.f32 %v3177_v45, %v1374_v44 }
 0x7e0   :  { %v3179_v1 = vpop.eup %3178  ;;  %3182 = vrsqrt.f32 %v1381_v13 }
 0x7e1   :  { %1392 = vperm.xlu1 %3037, %v1386_v47   ;;  %v1387_v48 = vmul.f32 %v3179_v1, %v1375_v46 }
 0x7e3   :  { %1397 = vperm.xlu0 %3038, %v1387_v48   ;;  %v1421_v58 = vpop.permute.xlu0 %1420 }
 0x7e6   :  { %v3181_v51 = vpop.eup %3180 }
 0x7e7   :  { %1430 = vperm.xlu0 %3038, %v1416_v49   ;;  %v1388_v52 = vmul.f32 %v3181_v51, %v1376_v50  ;;  %v3149_v50 = vld [vmem:[%s4094_s11 + $0x18] sm:$0xff]   ;;  %v3150_v51 = vld [vmem:[%s4094_s11 + $0x20] sm:$0xff]  }
 0x7e8   :  { %2938 = vmatprep.subr.bf16.mxu0 %v3150_v51 }
 0x7e9   :  { %1402 = vperm.xlu1 %3037, %v1388_v52   ;;  %v3151_v52 = vld [vmem:[%s4094_s11 + $0x30] sm:$0xff]  }
 0x7ea   :  { %v3183_v54 = vpop.eup %3182 }
 0x7eb   :  { %v1389_v55 = vmul.f32 %v3183_v54, %v1377_v53 }
 0x7ed   :  { %1407 = vperm.xlu1 %3037, %v1389_v55  }
 0x7f1   :  { %1435 = vperm.xlu1 %3037, %v1417_v56  }
 0x860   :  { %v1393_v21 = vpop.permute.xlu1 %1392 }
 0x861   :  { %v1410_v8 = vmul.f32 %v1393_v21, %v1354_v19  ;;  %v3140_v19 = vld [vmem:[%s4093_s10 + $0x10] sm:$0xff]   ;;  %v3152_v21 = vld [vmem:[%s4094_s11 + $0x28] sm:$0xff]  }
 0x862   :  { %v1398_v59 = vpop.permute.xlu0 %1397  ;;  %2906 = vmatprep.subr.bf16.mxu1 %v3140_v19 }
 0x863   :  { %v1438_v20 = vadd.f32 %v1421_v58, %v1410_v8  ;;  %v1411_v0 = vmul.f32 %v1398_v59, %v3812_v26  ;;  %v3141_v26 = vld [vmem:[%s4093_s10 + $0x18] sm:$0xff]   ;;  %2907 = vmatpush3.bf16.msra.mxu1 %v3140_v19  ;;  %v3154_v59 = vld [vmem:[%s4094_s11 + $0x40] sm:$0xff]  }
 0x864   :  { %2908 = vmatprep.subr.bf16.mxu1 %v3141_v26  ;;  %v3153_v8 = vld [vmem:[%s4094_s11 + $0x38] sm:$0xff]  }
 0x865   :  { %v1442_v2 = vmax.f32 %v1438_v20, 0.0  ;;  %v1439_v3 = vadd.f32 %v1426_v57, %v1411_v0  ;;  %v3155_v20 = vld [vmem:[%s4094_s11 + $0x50] sm:$0xff]   ;;  %v3156_v0 = vld [vmem:[%s4094_s11 + $0x48] sm:$0xff]  }
 0x866   :  { %v1431_v4 = vpop.permute.xlu0 %1430 }
 0x867   :  { %1446 = vst [vmem:[%s4092_s18] sm:$0xff] %v1442_v2  ;;  %v1443_v60 = vmax.f32 %v1439_v3, 0.0  ;;  %2909 = vmatpush3.bf16.msra.mxu1 %v3141_v26  ;;  %v3158_v3 = vld [vmem:[%s4094_s11 + $0x60] sm:$0xff]  }
 0x868   :  { %v1403_v7 = vpop.permute.xlu1 %1402  ;;  %2910 = vmatprep.subr.bf16.mxu1 %v3142_v27 }
 0x869   :  { %1447 = vst [vmem:[%s4092_s18 + $0x8] sm:$0xff] %v1443_v60  ;;  %v1412_v61 = vmul.f32 %v1403_v7, %v3816_v23  ;;  %v3079_v62 = vpack.i.bf16 %v1443_v60, %v1442_v2  ;;  %v3160_v7 = vld [vmem:[%s4094_s11 + $0x68] sm:$0xff]  }
 0x86b   :  { %v1440_v63 = vadd.f32 %v1431_v4, %v1412_v61  ;;  %3080 = vrot.lane.b32.xlu0 %v3079_v62, %s3196_s28  ;;  %2911 = vmatpush3.bf16.msra.mxu1 %v3142_v27  ;;  %v3161_v61 = vld [vmem:[%s4094_s11 + $0x78] sm:$0xff]   ;;  %v3162_v62 = vld [vmem:[%s4094_s11 + $0x80] sm:$0xff]   ;;  %v3163_v4 = vld [vmem:[%s4094_s11 + $0x88] sm:$0xff]  }
 0x86c   :  { %v1408_v5 = vpop.permute.xlu1 %1407  ;;  %2912 = vmatprep.subr.bf16.mxu1 %v3143_v28 }
 0x86d   :  { %v1444_v6 = vmax.f32 %v1440_v63, 0.0  ;;  %v1413_v9 = vmul.f32 %v1408_v5, %v3820_v33  ;;  %v3166_v63 = vld [vmem:[%s4095_s12 + $0x4] ss:$12 sps:$4 sm:$0xff]   ;;  %v3167_v5 = vld [vmem:[%s4095_s12 + $0x8] ss:$12 sps:$4 sm:$0xff]  }
 0x86f   :  { %1448 = vst [vmem:[%s4092_s18 + $0x10] sm:$0xff] %v1444_v6  ;;  %2913 = vmatpush3.bf16.msra.mxu1 %v3143_v28 }
 0x870   :  { %v1436_v10 = vpop.permute.xlu1 %1435  ;;  %2914 = vmatprep.subr.bf16.mxu1 %v3144_v11 }
 0x871   :  { %v1441_v15 = vadd.f32 %v1436_v10, %v1413_v9 }
 0x873   :  { %v1445_v18 = vmax.f32 %v1441_v15, 0.0  ;;  %2915 = vmatpush3.bf16.msra.mxu1 %v3144_v11 }
 0x874   :  { %2916 = vmatprep.subr.bf16.mxu1 %v3145_v34 }
 0x875   :  { %1449 = vst [vmem:[%s4092_s18 + $0x18] sm:$0xff] %v1445_v18  ;;  %v3084_v22 = vpack.i.bf16 %v1445_v18, %v1444_v6 }
 0x877   :  { %3085 = vrot.lane.b32.xlu1 %v3084_v22, %s3196_s28  ;;  %2917 = vmatpush3.bf16.msra.mxu1 %v3145_v34 }
 0x878   :  { %2930 = vmatprep.subr.bf16.mxu1 %v3148_v12 }
 0x8dd   :  { %v3081_v29 = vpop.permute.xlu0 %3080 }
 0x8de   :  { %v3083_v23 = vunpack.i.h.bf16 %v3081_v29  ;;  %v3082_v30 = vunpack.i.l.bf16 %v3081_v29 }
 0x8e0   :  { %v1459_v31 = vmax.f32 %v1443_v60, %v3083_v23  ;;  %v1458_v32 = vmax.f32 %v1442_v2, %v3082_v30  ;;  %v3157_v2 = vld [vmem:[%s4094_s11 + $0x58] sm:$0xff]   ;;  %v3159_v60 = vld [vmem:[%s4094_s11 + $0x70] sm:$0xff]  }
 0x8e2   :  { %v3089_v33 = vpack.i.bf16 %v1459_v31, %v1458_v32 }
 0x8e4   :  { %3090 = vrot.lane.b32.xlu0 %v3089_v33, %s3205_s2 }
 0x8e9   :  { %v3086_v35 = vpop.permute.xlu1 %3085 }
 0x8ea   :  { %v3088_v36 = vunpack.i.h.bf16 %v3086_v35  ;;  %v3087_v37 = vunpack.i.l.bf16 %v3086_v35 }
 0x8ec   :  { %v1461_v40 = vmax.f32 %v1445_v18, %v3088_v36  ;;  %v1460_v41 = vmax.f32 %v1444_v6, %v3087_v37 }
 0x8ee   :  { %v3094_v14 = vpack.i.bf16 %v1461_v40, %v1460_v41 }
 0x8f0   :  { %3095 = vrot.lane.b32.xlu1 %v3094_v14, %s3205_s2 }
 0x956   :  { %v3091_v24 = vpop.permute.xlu0 %3090 }
 0x957   :  { %v3093_v25 = vunpack.i.h.bf16 %v3091_v24  ;;  %v3092_v42 = vunpack.i.l.bf16 %v3091_v24 }
 0x959   :  { %v1471_v43 = vmax.f32 %v1459_v31, %v3093_v25  ;;  %v1470_v44 = vmax.f32 %v1458_v32, %v3092_v42 }
 0x95b   :  { %v1474_v45 = vpack.c.bf16 %v1471_v43, %v1470_v44 }
 0x95d   :  { %2918 = vmatprep.mubr.bf16.mxu1 %v1474_v45 }
 0x962   :  { %v3096_v13 = vpop.permute.xlu1 %3095 }
 0x963   :  { %v3098_v46 = vunpack.i.h.bf16 %v3096_v13  ;;  %v3097_v47 = vunpack.i.l.bf16 %v3096_v13 }
 0x965   :  { %v1473_v1 = vmax.f32 %v1461_v40, %v3098_v46  ;;  %v1472_v48 = vmax.f32 %v1460_v41, %v3097_v47 }
 0x967   :  { %v1475_v49 = vpack.c.bf16 %v1473_v1, %v1472_v48 }
 0x969   :  { %2919 = vmatmul.mubr.bf16.vlgmr.msra.gmra.mrb[8].mxu1 %v1475_v49 }
 0x96a   :  { %2931 = vmatpush3.bf16.msra.mxu1 %v3148_v12 }
 0x96b   :  { %2932 = vmatprep.subr.bf16.mxu1 %v3149_v50 }
 0x96e   :  { %2933 = vmatpush3.bf16.msra.mxu1 %v3149_v50 }
 0x96f   :  { %2946 = vmatprep.subr.bf16.mxu1 %v3151_v52 }
 0xa3c   :  { %v2920_v53 = vpop.f32.mrb[8].mxu1 }
 0xa3d   :  { %v1574_v54 = vpop.f32.mrb[9].mxu1 }
 0xa3e   :  { %v2921_v55 = vpop.f32.mrb[10].mxu1 }
 0xa3f   :  { %v1590_v56 = vpack.c.bf16 %v2921_v55, %v2920_v53  ;;  %v1577_v57 = vpop.f32.mrb[11].mxu1 }
 0xa40   :  { %v1589_v58 = vpack.c.bf16 %v1577_v57, %v1574_v54 }
 0xa42   :  { %2926 = vmatprep.mubr.msk.bf16.mxu0 %vm1607_vm11, %v1589_v58  ;;  %2934 = vmatprep.mubr.msk.bf16.mxu1 %vm1607_vm11, %v1589_v58 }
 0xa43   :  { %2927 = vmatmul.mubr.msk.bf16.vlgmr.msra.gmra.mrb[16].mxu0 %vm1607_vm11, %v1590_v56  ;;  %2935 = vmatmul.mubr.msk.bf16.vlgmr.msra.gmra.mrb[12].mxu1 %vm1607_vm11, %v1590_v56 }
 0xa44   :  { %2939 = vmatpush3.bf16.msra.mxu0 %v3150_v51  ;;  %2942 = vmatprep.mubr.msk.bf16.mxu0 %vm1607_vm11, %v1589_v58 }
 0xa45   :  { %2947 = vmatpush3.bf16.msra.mxu1 %v3151_v52  ;;  %2950 = vmatprep.mubr.msk.bf16.mxu1 %vm1607_vm11, %v1589_v58 }
 0xa46   :  { %2940 = vmatprep.subr.bf16.mxu0 %v3152_v21  ;;  %2948 = vmatprep.subr.bf16.mxu1 %v3153_v8 }
 0xa48   :  { %2941 = vmatpush3.bf16.msra.mxu0 %v3152_v21 }
 0xa49   :  { %2949 = vmatpush3.bf16.msra.mxu1 %v3153_v8  ;;  %2954 = vmatprep.subr.bf16.mxu0 %v3154_v59 }
 0xa4a   :  { %2962 = vmatprep.subr.bf16.mxu1 %v3155_v20 }
 0xa4b   :  { %2943 = vmatmul.mubr.msk.bf16.vlgmr.msra.gmra.mrb[20].mxu0 %vm1607_vm11, %v1590_v56 }
 0xa4c   :  { %2951 = vmatmul.mubr.msk.bf16.vlgmr.msra.gmra.mrb[16].mxu1 %vm1607_vm11, %v1590_v56  ;;  %2955 = vmatpush3.bf16.msra.mxu0 %v3154_v59 }
 0xa4d   :  { %2958 = vmatprep.mubr.msk.bf16.mxu0 %vm1607_vm11, %v1589_v58  ;;  %2963 = vmatpush3.bf16.msra.mxu1 %v3155_v20 }
 0xa4e   :  { %2966 = vmatprep.mubr.msk.bf16.mxu1 %vm1607_vm11, %v1589_v58  ;;  %2956 = vmatprep.subr.bf16.mxu0 %v3156_v0 }
 0xa4f   :  { %2964 = vmatprep.subr.bf16.mxu1 %v3157_v2 }
 0xa50   :  { %2957 = vmatpush3.bf16.msra.mxu0 %v3156_v0 }
 0xa51   :  { %2965 = vmatpush3.bf16.msra.mxu1 %v3157_v2  ;;  %2970 = vmatprep.subr.bf16.mxu0 %v3158_v3 }
 0xa52   :  { %2978 = vmatprep.subr.bf16.mxu1 %v3159_v60 }
 0xa53   :  { %2959 = vmatmul.mubr.msk.bf16.vlgmr.msra.gmra.mrb[24].mxu0 %vm1607_vm11, %v1590_v56 }
 0xa54   :  { %2967 = vmatmul.mubr.msk.bf16.vlgmr.msra.gmra.mrb[20].mxu1 %vm1607_vm11, %v1590_v56  ;;  %2971 = vmatpush3.bf16.msra.mxu0 %v3158_v3 }
 0xa55   :  { %2974 = vmatprep.mubr.msk.bf16.mxu0 %vm1607_vm11, %v1589_v58  ;;  %2979 = vmatpush3.bf16.msra.mxu1 %v3159_v60 }
 0xa56   :  { %2982 = vmatprep.mubr.msk.bf16.mxu1 %vm1607_vm11, %v1589_v58  ;;  %2972 = vmatprep.subr.bf16.mxu0 %v3160_v7 }
 0xa57   :  { %2980 = vmatprep.subr.bf16.mxu1 %v3161_v61 }
 0xa58   :  { %2973 = vmatpush3.bf16.msra.mxu0 %v3160_v7 }
 0xa59   :  { %2981 = vmatpush3.bf16.msra.mxu1 %v3161_v61  ;;  %2986 = vmatprep.subr.bf16.mxu0 %v3162_v62 }
 0xa5b   :  { %2975 = vmatmul.mubr.msk.bf16.vlgmr.msra.gmra.mrb[28].mxu0 %vm1607_vm11, %v1590_v56 }
 0xa5c   :  { %2983 = vmatmul.mubr.msk.bf16.vlgmr.msra.gmra.mrb[24].mxu1 %vm1607_vm11, %v1590_v56  ;;  %2987 = vmatpush3.bf16.msra.mxu0 %v3162_v62 }
 0xa5d   :  { %2990 = vmatprep.mubr.msk.bf16.mxu0 %vm1607_vm11, %v1589_v58  ;;  %2988 = vmatprep.subr.bf16.mxu0 %v3163_v4 }
 0xa5e   :  { %2357 = vmatprep.mubr.bf16.mxu1 %v3166_v63 }
 0xa60   :  { %2989 = vmatpush3.bf16.msra.mxu0 %v3163_v4 }
 0xa63   :  { %2991 = vmatmul.mubr.msk.bf16.vlgmr.msra.gmra.mrb[32].mxu0 %vm1607_vm11, %v1590_v56 }
 0xa64   :  { %2998 = vmatprep.mubr.msk.bf16.mxu0 %vm1607_vm11, %v3167_v5 }
 0xb16   :  { %v2928_v6 = vpop.f32.mrb[16].mxu0  ;;  %v2936_v9 = vpop.f32.mrb[12].mxu1 }
 0xb17   :  { %1665 = vst.msk [vmem:[#allocation4 + $0x10] sm:$0xff] %vm1607_vm11, %v2928_v6  ;;  %1735 = vst.msk [vmem:[#allocation4 + $0x30] sm:$0xff] %vm1607_vm11, %v2936_v9  ;;  %v1648_v10 = vpop.f32.mrb[17].mxu0  ;;  %v1718_v15 = vpop.f32.mrb[13].mxu1 }
 0xb18   :  { %1663 = vst.msk [vmem:[#allocation4] sm:$0xff] %vm1607_vm11, %v1648_v10  ;;  %1733 = vst.msk [vmem:[#allocation4 + $0x20] sm:$0xff] %vm1607_vm11, %v1718_v15  ;;  %v2929_v16 = vpop.f32.mrb[18].mxu0  ;;  %v2937_v17 = vpop.f32.mrb[14].mxu1 }
 0xb19   :  { %1666 = vst.msk [vmem:[#allocation4 + $0x18] sm:$0xff] %vm1607_vm11, %v2929_v16  ;;  %1736 = vst.msk [vmem:[#allocation4 + $0x38] sm:$0xff] %vm1607_vm11, %v2937_v17  ;;  %v1651_v18 = vpop.f32.mrb[19].mxu0  ;;  %v1721_v19 = vpop.f32.mrb[15].mxu1 }
 0xb1a   :  { %1664 = vst.msk [vmem:[#allocation4 + $0x8] sm:$0xff] %vm1607_vm11, %v1651_v18  ;;  %1734 = vst.msk [vmem:[#allocation4 + $0x28] sm:$0xff] %vm1607_vm11, %v1721_v19 }
 0xb1e   :  { %v2944_v22 = vpop.f32.mrb[20].mxu0  ;;  %v2237_v53 = vld [vmem:[#allocation4 + $0x10] sm:$0xff] }
 0xb1f   :  { %1805 = vst.msk [vmem:[#allocation4 + $0x50] sm:$0xff] %vm1607_vm11, %v2944_v22  ;;  %v2952_v26 = vpop.f32.mrb[16].mxu1  ;;  %v1788_v27 = vpop.f32.mrb[21].mxu0  ;;  %v2235_v47 = vld [vmem:[#allocation4] sm:$0xff]  ;;  %v2241_v61 = vld [vmem:[#allocation4 + $0x30] sm:$0xff] }
 0xb20   :  { %1875 = vst.msk [vmem:[#allocation4 + $0x70] sm:$0xff] %vm1607_vm11, %v2952_v26  ;;  %1803 = vst.msk [vmem:[#allocation4 + $0x40] sm:$0xff] %vm1607_vm11, %v1788_v27  ;;  %v1858_v28 = vpop.f32.mrb[17].mxu1  ;;  %v2945_v29 = vpop.f32.mrb[22].mxu0  ;;  %v2238_v50 = vld [vmem:[#allocation4 + $0x18] sm:$0xff]  ;;  %v2239_v20 = vld [vmem:[#allocation4 + $0x20] sm:$0xff] }
 0xb21   :  { %1873 = vst.msk [vmem:[#allocation4 + $0x60] sm:$0xff] %vm1607_vm11, %v1858_v28  ;;  %1806 = vst.msk [vmem:[#allocation4 + $0x58] sm:$0xff] %vm1607_vm11, %v2945_v29  ;;  %v2953_v11 = vpop.f32.mrb[18].mxu1  ;;  %v1791_v23 = vpop.f32.mrb[23].mxu0  ;;  %v2236_v24 = vld [vmem:[#allocation4 + $0x8] sm:$0xff]  ;;  %v2272_v55 = vpack.c.bf16 %v2238_v50, %v2237_v53  ;;  %v2242_v60 = vld [vmem:[#allocation4 + $0x38] sm:$0xff] }
 0xb22   :  { %1876 = vst.msk [vmem:[#allocation4 + $0x78] sm:$0xff] %vm1607_vm11, %v2953_v11  ;;  %1804 = vst.msk [vmem:[#allocation4 + $0x48] sm:$0xff] %vm1607_vm11, %v1791_v23  ;;  %v1861_v30 = vpop.f32.mrb[19].mxu1  ;;  %v2271_v1 = vpack.c.bf16 %v2236_v24, %v2235_v47  ;;  %v2240_v21 = vld [vmem:[#allocation4 + $0x28] sm:$0xff]  ;;  %v2274_v62 = vpack.c.bf16 %v2242_v60, %v2241_v61  ;;  %v3171_v24 = vld [vmem:[%s4095_s12 + $0x18] ss:$12 sps:$4 sm:$0xff]  }
 0xb23   :  { %1874 = vst.msk [vmem:[#allocation4 + $0x68] sm:$0xff] %vm1607_vm11, %v1861_v30  ;;  %v2273_v0 = vpack.c.bf16 %v2240_v21, %v2239_v20 }
 0xb26   :  { %v2960_v31 = vpop.f32.mrb[24].mxu0  ;;  %v2245_v11 = vld [vmem:[#allocation4 + $0x50] sm:$0xff] }
 0xb27   :  { %1945 = vst.msk [vmem:[#allocation4 + $0x90] sm:$0xff] %vm1607_vm11, %v2960_v31  ;;  %v2968_v32 = vpop.f32.mrb[20].mxu1  ;;  %v1928_v33 = vpop.f32.mrb[25].mxu0  ;;  %v2243_v17 = vld [vmem:[#allocation4 + $0x40] sm:$0xff] }
 0xb28   :  { %2015 = vst.msk [vmem:[#allocation4 + $0xb0] sm:$0xff] %vm1607_vm11, %v2968_v32  ;;  %1943 = vst.msk [vmem:[#allocation4 + $0x80] sm:$0xff] %vm1607_vm11, %v1928_v33  ;;  %v1998_v34 = vpop.f32.mrb[21].mxu1  ;;  %v2961_v35 = vpop.f32.mrb[26].mxu0  ;;  %v2246_v28 = vld [vmem:[#allocation4 + $0x58] sm:$0xff] }
 0xb29   :  { %2013 = vst.msk [vmem:[#allocation4 + $0xa0] sm:$0xff] %vm1607_vm11, %v1998_v34  ;;  %1946 = vst.msk [vmem:[#allocation4 + $0x98] sm:$0xff] %vm1607_vm11, %v2961_v35  ;;  %v2969_v36 = vpop.f32.mrb[22].mxu1  ;;  %v1931_v37 = vpop.f32.mrb[27].mxu0  ;;  %v2244_v5 = vld [vmem:[#allocation4 + $0x48] sm:$0xff]  ;;  %v2276_v23 = vpack.c.bf16 %v2246_v28, %v2245_v11  ;;  %v2247_v35 = vld [vmem:[#allocation4 + $0x60] sm:$0xff] }
 0xb2a   :  { %2016 = vst.msk [vmem:[#allocation4 + $0xb8] sm:$0xff] %vm1607_vm11, %v2969_v36  ;;  %1944 = vst.msk [vmem:[#allocation4 + $0x88] sm:$0xff] %vm1607_vm11, %v1931_v37  ;;  %v2001_v38 = vpop.f32.mrb[23].mxu1  ;;  %v2275_v18 = vpack.c.bf16 %v2244_v5, %v2243_v17  ;;  %v2248_v32 = vld [vmem:[#allocation4 + $0x68] sm:$0xff] }
 0xb2b   :  { %2014 = vst.msk [vmem:[#allocation4 + $0xa8] sm:$0xff] %vm1607_vm11, %v2001_v38  ;;  %v3168_v33 = vld [vmem:[%s4095_s12 + $0x20] ss:$12 sps:$4 sm:$0xff]   ;;  %v2277_v36 = vpack.c.bf16 %v2248_v32, %v2247_v35 }
 0xb2c   :  { %v2505_v28 = vld [vmem:[%s4096_s14 + $0x8] sm:$0xff] }
 0xb2e   :  { %v2976_v39 = vpop.f32.mrb[28].mxu0  ;;  %v2253_v48 = vld [vmem:[#allocation4 + $0x90] sm:$0xff] }
 0xb2f   :  { %2085 = vst.msk [vmem:[#allocation4 + $0xd0] sm:$0xff] %vm1607_vm11, %v2976_v39  ;;  %v2984_v40 = vpop.f32.mrb[24].mxu1  ;;  %v2068_v41 = vpop.f32.mrb[29].mxu0  ;;  %v2251_v43 = vld [vmem:[#allocation4 + $0x80] sm:$0xff]  ;;  %v2257_v2 = vld [vmem:[#allocation4 + $0xb0] sm:$0xff]  ;;  %v2250_v39 = vld [vmem:[#allocation4 + $0x78] sm:$0xff] }
 0xb30   :  { %2155 = vst.msk [vmem:[#allocation4 + $0xf0] sm:$0xff] %vm1607_vm11, %v2984_v40  ;;  %2083 = vst.msk [vmem:[#allocation4 + $0xc0] sm:$0xff] %vm1607_vm11, %v2068_v41  ;;  %v2138_v12 = vpop.f32.mrb[25].mxu1  ;;  %v2977_v14 = vpop.f32.mrb[30].mxu0  ;;  %v2254_v45 = vld [vmem:[#allocation4 + $0x98] sm:$0xff]  ;;  %v2255_v56 = vld [vmem:[#allocation4 + $0xa0] sm:$0xff] }
 0xb31   :  { %2153 = vst.msk [vmem:[#allocation4 + $0xe0] sm:$0xff] %vm1607_vm11, %v2138_v12  ;;  %2086 = vst.msk [vmem:[#allocation4 + $0xd8] sm:$0xff] %vm1607_vm11, %v2977_v14  ;;  %v2985_v25 = vpop.f32.mrb[26].mxu1  ;;  %v2071_v42 = vpop.f32.mrb[31].mxu0  ;;  %v2252_v44 = vld [vmem:[#allocation4 + $0x88] sm:$0xff]  ;;  %v2280_v49 = vpack.c.bf16 %v2254_v45, %v2253_v48  ;;  %v2258_v59 = vld [vmem:[#allocation4 + $0xb8] sm:$0xff] }
 0xb32   :  { %2156 = vst.msk [vmem:[#allocation4 + $0xf8] sm:$0xff] %vm1607_vm11, %v2985_v25  ;;  %2084 = vst.msk [vmem:[#allocation4 + $0xc8] sm:$0xff] %vm1607_vm11, %v2071_v42  ;;  %v2141_v13 = vpop.f32.mrb[27].mxu1  ;;  %v2279_v46 = vpack.c.bf16 %v2252_v44, %v2251_v43  ;;  %v2256_v51 = vld [vmem:[#allocation4 + $0xa8] sm:$0xff]  ;;  %v2282_v3 = vpack.c.bf16 %v2258_v59, %v2257_v2  ;;  %v2249_v40 = vld [vmem:[#allocation4 + $0x70] sm:$0xff] }
 0xb33   :  { %2154 = vst.msk [vmem:[#allocation4 + $0xe8] sm:$0xff] %vm1607_vm11, %v2141_v13  ;;  %v2281_v58 = vpack.c.bf16 %v2256_v51, %v2255_v56  ;;  %v2278_v41 = vpack.c.bf16 %v2250_v39, %v2249_v40  ;;  %v3164_v12 = vld [vmem:[%s4095_s12] ss:$12 sps:$4 sm:$0xff]   ;;  %v3169_v14 = vld [vmem:[%s4095_s12 + $0x1c] ss:$12 sps:$4 sm:$0xff]  }
 0xb34   :  { %2865 = vmatprep.subr.bf16.mxu1 %v2279_v46 }
 0xb35   :  { %2866 = vmatpush3.bf16.msra.mxu1 %v2271_v1 }
 0xb36   :  { %v2992_v52 = vpop.f32.mrb[32].mxu0  ;;  %2867 = vmatprep.subr.bf16.mxu1 %v2280_v49  ;;  %v2261_v19 = vld [vmem:[#allocation4 + $0xd0] sm:$0xff] }
 0xb37   :  { %2225 = vst.msk [vmem:[#allocation4 + $0x110] sm:$0xff] %vm1607_vm11, %v2992_v52  ;;  %v2208_v54 = vpop.f32.mrb[33].mxu0  ;;  %v2259_v4 = vld [vmem:[#allocation4 + $0xc0] sm:$0xff]  ;;  %v2265_v37 = vld [vmem:[#allocation4 + $0xf0] sm:$0xff] }
 0xb38   :  { %2223 = vst.msk [vmem:[#allocation4 + $0x100] sm:$0xff] %vm1607_vm11, %v2208_v54  ;;  %v2993_v57 = vpop.f32.mrb[34].mxu0  ;;  %v2262_v6 = vld [vmem:[#allocation4 + $0xd8] sm:$0xff]  ;;  %v2263_v30 = vld [vmem:[#allocation4 + $0xe0] sm:$0xff] }
 0xb39   :  { %2226 = vst.msk [vmem:[#allocation4 + $0x118] sm:$0xff] %vm1607_vm11, %v2993_v57  ;;  %v2211_v8 = vpop.f32.mrb[35].mxu0  ;;  %2868 = vmatpush3.bf16.msra.mxu1 %v2272_v55  ;;  %v2260_v7 = vld [vmem:[#allocation4 + $0xc8] sm:$0xff]  ;;  %v2284_v26 = vpack.c.bf16 %v2262_v6, %v2261_v19  ;;  %v2266_v34 = vld [vmem:[#allocation4 + $0xf8] sm:$0xff] }
 0xb3a   :  { %2224 = vst.msk [vmem:[#allocation4 + $0x108] sm:$0xff] %vm1607_vm11, %v2211_v8  ;;  %2869 = vmatprep.subr.bf16.mxu1 %v2281_v58  ;;  %v2283_v63 = vpack.c.bf16 %v2260_v7, %v2259_v4  ;;  %v2264_v29 = vld [vmem:[#allocation4 + $0xe8] sm:$0xff]  ;;  %v2286_v38 = vpack.c.bf16 %v2266_v34, %v2265_v37 }
 0xb3b   :  { %v2285_v31 = vpack.c.bf16 %v2264_v29, %v2263_v30 }
 0xb3d   :  { %2870 = vmatpush3.bf16.msra.mxu1 %v2273_v0 }
 0xb3e   :  { %2871 = vmatprep.subr.bf16.mxu1 %v2282_v3  ;;  %v2269_v22 = vld [vmem:[#allocation4 + $0x110] sm:$0xff] }
 0xb3f   :  { %v2267_v9 = vld [vmem:[#allocation4 + $0x100] sm:$0xff] }
 0xb40   :  { %v2270_v15 = vld [vmem:[#allocation4 + $0x118] sm:$0xff] }
 0xb41   :  { %2872 = vmatpush3.bf16.msra.mxu1 %v2274_v62  ;;  %v2268_v10 = vld [vmem:[#allocation4 + $0x108] sm:$0xff]  ;;  %v2288_v27 = vpack.c.bf16 %v2270_v15, %v2269_v22 }
 0xb42   :  { %2873 = vmatprep.subr.bf16.mxu1 %v2283_v63  ;;  %v2287_v16 = vpack.c.bf16 %v2268_v10, %v2267_v9 }
 0xb44   :  { %2994 = vmatprep.subr.bf16.mxu0 %v2287_v16 }
 0xb45   :  { %2874 = vmatpush3.bf16.msra.mxu1 %v2275_v18  ;;  %2995 = vmatpush3.bf16.msra.mxu0 %v2287_v16 }
 0xb46   :  { %2875 = vmatprep.subr.bf16.mxu1 %v2284_v26  ;;  %2996 = vmatprep.subr.bf16.mxu0 %v2288_v27 }
 0xb49   :  { %2876 = vmatpush3.bf16.msra.mxu1 %v2276_v23  ;;  %2997 = vmatpush3.bf16.msra.mxu0 %v2288_v27  ;;  %v2504_v27 = vld [vmem:[%s4096_s14] sm:$0xff] }
 0xb4a   :  { %2877 = vmatprep.subr.bf16.mxu1 %v2285_v31 }
 0xb4c   :  { %2999 = vmatmul.mubr.msk.bf16.vlgmr.msra.gmra.mrb[36].mxu0 %vm1607_vm11, %v3168_v33 }
 0xb4d   :  { %2878 = vmatpush3.bf16.msra.mxu1 %v2277_v36 }
 0xb4e   :  { %2879 = vmatprep.subr.bf16.mxu1 %v2286_v38  ;;  %v2464_v38 = vld [vmem:[%s4097_s13] sm:$0xff] }
 0xb51   :  { %2880 = vmatpush3.bf16.msra.mxu1 %v2278_v41  ;;  %v2465_v41 = vld [vmem:[%s4097_s13 + $0x8] sm:$0xff] }
 0xb54   :  { %2358 = vmatmul.mubr.bf16.vlgmr.msra.gmra.mrb[28].mxu1 %v3164_v12 }
 0xb55   :  { %2365 = vmatprep.mubr.bf16.mxu1 %v3169_v14 }
 0xb5c   :  { %2366 = vmatmul.mubr.bf16.gmra.mrb[32].mxu1 %v3171_v24 }
 0xc1f   :  { %v3000_v25 = vpop.f32.mrb[36].mxu0 }
 0xc20   :  { %v2408_v42 = vpop.f32.mrb[37].mxu0 }
 0xc21   :  { %v3001_v43 = vpop.f32.mrb[38].mxu0 }
 0xc22   :  { %v2411_v44 = vpop.f32.mrb[39].mxu0 }
 0xc27   :  { %v2881_v45 = vpop.f32.mrb[28].mxu1 }
 0xc28   :  { %v2882_v13 = vpop.f32.mrb[29].mxu1 }
 0xc29   :  { %v2883_v46 = vadd.f32 %v2882_v13, %v2881_v45  ;;  %v2884_v47 = vpop.f32.mrb[30].mxu1  ;;  %v2506_v13 = vld [vmem:[%s4096_s14 + $0x10] sm:$0xff] }
 0xc2a   :  { %v2885_v1 = vpop.f32.mrb[31].mxu1 }
 0xc2b   :  { %v2886_v48 = vadd.f32 %v2885_v1, %v2884_v47  ;;  %v2409_v49 = vadd.f32 %v2883_v46, %v2408_v42  ;;  %v3207_v46 = vmov 0.0|0.0   ;;  %v2537_v1 = vld [vmem:[%s4098_s16] sm:$0x3] }
 0xc2c   :  { %3013 = vmatprep.subr.bf16.mxu0 %v3207_v46 }
 0xc2d   :  { %v2412_v50 = vadd.f32 %v2886_v48, %v2411_v44  ;;  %v2423_v51 = vsel %vm1607_vm11, %v2409_v49, 0.0  ;;  %v2467_v44 = vld [vmem:[%s4097_s13 + $0x18] sm:$0xff] }
 0xc2e   :  { %2424 = vadd.xlane.f32.xlu0 %v2423_v51  ;;  %v2507_v48 = vld [vmem:[%s4096_s14 + $0x18] sm:$0xff] }
 0xc2f   :  { %v2887_v52 = vpop.f32.mrb[32].mxu1  ;;  %v2426_v53 = vsel %vm1607_vm11, %v2412_v50, 0.0 }
 0xc30   :  { %v2888_v54 = vpop.f32.mrb[33].mxu1  ;;  %2427 = vadd.xlane.f32.xlu1 %v2426_v53 }
 0xc31   :  { %v2889_v55 = vadd.f32 %v2888_v54, %v2887_v52  ;;  %v2890_v56 = vpop.f32.mrb[34].mxu1 }
 0xc32   :  { %v2891_v57 = vpop.f32.mrb[35].mxu1 }
 0xc33   :  { %v2892_v58 = vadd.f32 %v2891_v57, %v2890_v56  ;;  %v2417_v21 = vadd.f32 %v3000_v25, %v2889_v55  ;;  %v2466_v25 = vld [vmem:[%s4097_s13 + $0x10] sm:$0xff] }
 0xc35   :  { %v2429_v8 = vsel %vm1607_vm11, %v2417_v21, 0.0  ;;  %v2420_v59 = vadd.f32 %v3001_v43, %v2892_v58 }
 0xc36   :  { %2430 = vadd.xlane.f32.xlu0 %v2429_v8 }
 0xc37   :  { %v2432_v20 = vsel %vm1607_vm11, %v2420_v59, 0.0 }
 0xc3a   :  { %2433 = vadd.xlane.f32.xlu0 %v2432_v20 }
 0xcbb   :  { %v2425_v0 = vpop.xlane.xlu0 %2424 }
 0xcbc   :  { %v2436_v2 = vmul.f32 0.03125, %v2425_v0 }
 0xcbd   :  { %v2428_v3 = vpop.xlane.xlu1 %2427 }
 0xcbe   :  { %v4023_v60 = vsub.f32 %v2409_v49, %v2436_v2  ;;  %v2437_v7 = vmul.f32 0.03125, %v2428_v3  ;;  %v3209_v49 = vmov 0.0  }
 0xcbf   :  { %3010 = vmatprep.mubr.msk.f32.mxu0 %vm3208_vm12, %v3209_v49 }
 0xcc0   :  { %v4025_v61 = vsub.f32 %v2412_v50, %v2437_v7  ;;  %v2444_v62 = vmul.f32 %v4023_v60, %v4023_v60 }
 0xcc2   :  { %v2448_v4 = vsel %vm1607_vm11, %v2444_v62, 0.0  ;;  %v2445_v63 = vmul.f32 %v4025_v61, %v4025_v61 }
 0xcc3   :  { %2449 = vadd.xlane.f32.xlu1 %v2448_v4  ;;  %v2431_v5 = vpop.xlane.xlu0 %2430 }
 0xcc4   :  { %v2438_v6 = vmul.f32 0.03125, %v2431_v5  ;;  %v2451_v9 = vsel %vm1607_vm11, %v2445_v63, 0.0 }
 0xcc5   :  { %2452 = vadd.xlane.f32.xlu0 %v2451_v9 }
 0xcc6   :  { %v4033_v10 = vsub.f32 %v2417_v21, %v2438_v6 }
 0xcc7   :  { %v2434_v15 = vpop.xlane.xlu0 %2433 }
 0xcc8   :  { %v2439_v16 = vmul.f32 0.03125, %v2434_v15  ;;  %v2446_v17 = vmul.f32 %v4033_v10, %v4033_v10 }
 0xcca   :  { %v4037_v18 = vsub.f32 %v2420_v59, %v2439_v16  ;;  %v2454_v19 = vsel %vm1607_vm11, %v2446_v17, 0.0 }
 0xccb   :  { %2455 = vadd.xlane.f32.xlu1 %v2454_v19 }
 0xccc   :  { %v2447_v22 = vmul.f32 %v4037_v18, %v4037_v18 }
 0xcce   :  { %v2457_v26 = vsel %vm1607_vm11, %v2447_v22, 0.0 }
 0xccf   :  { %2458 = vadd.xlane.f32.xlu0 %v2457_v26 }
 0xcdc   :  { %2510 = vperm.xlu1 %3037, %v2504_v27  }
 0xce0   :  { %2515 = vperm.xlu1 %3037, %v2505_v28  }
 0xd50   :  { %v2450_v29 = vpop.xlane.xlu1 %2449 }
 0xd51   :  { %v2460_v11 = vmul.f32 0.03125, %v2450_v29 }
 0xd52   :  { %v2453_v23 = vpop.xlane.xlu0 %2452 }
 0xd53   :  { %v2468_v30 = vadd.f32 1e-05, %v2460_v11  ;;  %v2461_v31 = vmul.f32 0.03125, %v2453_v23 }
 0xd55   :  { %3184 = vrsqrt.f32 %v2468_v30  ;;  %v2469_v32 = vadd.f32 1e-05, %v2461_v31 }
 0xd57   :  { %3186 = vrsqrt.f32 %v2469_v32 }
 0xd58   :  { %v2456_v33 = vpop.xlane.xlu1 %2455 }
 0xd59   :  { %v2462_v34 = vmul.f32 0.03125, %v2456_v33 }
 0xd5b   :  { %v2470_v35 = vadd.f32 1e-05, %v2462_v34 }
 0xd5c   :  { %v2459_v36 = vpop.xlane.xlu0 %2458  ;;  %v2511_v50 = vpop.permute.xlu1 %2510 }
 0xd5d   :  { %3188 = vrsqrt.f32 %v2470_v35  ;;  %v2463_v37 = vmul.f32 0.03125, %v2459_v36 }
 0xd5f   :  { %v3185_v39 = vpop.eup %3184  ;;  %v2471_v40 = vadd.f32 1e-05, %v2463_v37 }
 0xd60   :  { %v2476_v12 = vmul.f32 %v3185_v39, %v2464_v38  ;;  %v2516_v51 = vpop.permute.xlu1 %2515 }
 0xd61   :  { %v3187_v14 = vpop.eup %3186  ;;  %3190 = vrsqrt.f32 %v2471_v40 }
 0xd62   :  { %2482 = vperm.xlu1 %3037, %v2476_v12   ;;  %v2477_v24 = vmul.f32 %v3187_v14, %v2465_v41 }
 0xd64   :  { %2487 = vperm.xlu0 %3038, %v2477_v24  }
 0xd67   :  { %v3189_v42 = vpop.eup %3188 }
 0xd68   :  { %v2478_v43 = vmul.f32 %v3189_v42, %v2466_v25 }
 0xd6a   :  { %2492 = vperm.xlu0 %3038, %v2478_v43  }
 0xd6b   :  { %v3191_v45 = vpop.eup %3190 }
 0xd6c   :  { %v2479_v47 = vmul.f32 %v3191_v45, %v2467_v44 }
 0xd6e   :  { %2520 = vperm.xlu0 %3038, %v2506_v13   ;;  %2497 = vperm.xlu1 %3037, %v2479_v47  }
 0xd72   :  { %2540 = vperm.xlu0 %3038, %v2537_v1   ;;  %2525 = vperm.xlu1 %3037, %v2507_v48  }
 0xde1   :  { %v2483_v52 = vpop.permute.xlu1 %2482 }
 0xde2   :  { %v2500_v53 = vmul.f32 %v2483_v52, %v4023_v60 }
 0xde3   :  { %v2488_v54 = vpop.permute.xlu0 %2487 }
 0xde4   :  { %v2528_v55 = vadd.f32 %v2511_v50, %v2500_v53  ;;  %v2501_v56 = vmul.f32 %v2488_v54, %v4025_v61  ;;  %v2536_v61 = vld [vmem:[%s4099_s15] sm:$0x3] }
 0xde6   :  { %v2529_v57 = vadd.f32 %v2516_v51, %v2501_v56  ;;  %v2532_v58 = vmax.f32 %v2528_v55, 0.0 }
 0xde8   :  { %v2533_v21 = vmax.f32 %v2529_v57, 0.0 }
 0xde9   :  { %v2493_v8 = vpop.permute.xlu0 %2492 }
 0xdea   :  { %v3014_v59 = vpack.c.bf16 %v2533_v21, %v2532_v58  ;;  %v2502_v2 = vmul.f32 %v2493_v8, %v4033_v10 }
 0xdec   :  { %3015 = vmatpush3.bf16.msra.mxu0 %v3014_v59 }
 0xded   :  { %v2498_v20 = vpop.permute.xlu1 %2497  ;;  %v2521_v0 = vpop.permute.xlu0 %2520  ;;  %3016 = vmatprep.subr.bf16.mxu0 %v3207_v46 }
 0xdee   :  { %v2503_v3 = vmul.f32 %v2498_v20, %v4037_v18  ;;  %v2530_v7 = vadd.f32 %v2521_v0, %v2502_v2 }
 0xdf0   :  { %v2534_v4 = vmax.f32 %v2530_v7, 0.0 }
 0xdf1   :  { %v2526_v62 = vpop.permute.xlu1 %2525  ;;  %v2541_v6 = vpop.permute.xlu0 %2540 }
 0xdf2   :  { %v2531_v60 = vadd.f32 %v2526_v62, %v2503_v3 }
 0xdf4   :  { %v2535_v63 = vmax.f32 %v2531_v60, 0.0 }
 0xdf6   :  { %v3017_v5 = vpack.c.bf16 %v2535_v63, %v2534_v4 }
 0xdf8   :  { %3018 = vmatpush3.bf16.msra.mxu0 %v3017_v5 }
 0xdfb   :  { %3011 = vmatmul.mubr.msk.f32.vlgmr.msra.gmra.mrb[40].mxu0 %vm1607_vm11, %v2536_v61 }
 0xece   :  { %v2612_v9 = vpop.f32.mrb[40].mxu0 }
 0xecf   :  { %v2613_v15 = vadd.f32 %v2612_v9, %v2541_v6  ;;  %v3012_v10 = vpop.f32.mrb[41].mxu0 }
 0xed1   :  { %2617 = vst.msk [vmem:[%s4100_s19] sm:$0x3] %vm2616_vm13, %v2613_v15 }

</bundles_post_ra>
